<compile_context>
chip_gen: v7x
topology: tpu7x:2x2x1
jax: 0.10.0
libtpu: 0.0.40
codegen_flags: <defaults>
</compile_context>

<pallas_src>
import functools
import math

import jax
import jax.numpy as jnp
from jax.experimental import pallas as pl
from jax.experimental.pallas import tpu as pltpu

ALPHA = 16.0       # LoRA alpha (LoRALayer default); folded into the LoRA B matrices.
LORA_LANES = 128   # LoRA rank is zero-padded to a full 128-lane vreg width.


def _quick_gelu(v):
    return v * jax.nn.sigmoid(1.702 * v)


def _mlp_lora_kernel(
    x_ref,      # (TM, D)   bf16 row tile of x
    w1_ref,     # (D, TH)   bf16 c_fc weight column-chunk
    b1_ref,     # (1, TH)   f32  c_fc bias chunk
    w2_ref,     # (TH, D)   bf16 c_proj weight row-chunk
    b2_ref,     # (1, D)    f32  c_proj bias (resident)
    la1_ref,    # (D, R)    bf16 LoRA A (fc), rank padded to R lanes (resident)
    lb1_ref,    # (R, TH)   bf16 LoRA B*alpha (fc) column-chunk
    la2_ref,    # (TH, R)   bf16 LoRA A (proj) row-chunk
    lb2_ref,    # (R, D)    bf16 LoRA B*alpha (proj) (resident)
    out_ref,    # (TM, D)   output row tile (written once, on the last chunk)
    acc_ref,    # (TM, D)   f32  proj accumulator (scratch)
    t1_ref,     # (TM, R)   bf16 x @ A_fc, reused across chunks (scratch)
    t2_ref,     # (TM, R)   f32  sum_k h_k @ A_proj[k] accumulator (scratch)
    *,
    block_rows,
    n_main,     # first det row (global row index); rows >= n_main take LoRA
    aligned,    # True when n_main is a tile boundary -> no per-row mask needed
):
    i = pl.program_id(0)
    k = pl.program_id(1)
    row0 = i * block_rows

    full_det = row0 >= n_main
    if aligned:
        has_det = full_det
    else:
        has_det = (row0 + block_rows) > n_main
        no_det = jnp.logical_not(has_det)
        straddle = jnp.logical_and(has_det, jnp.logical_not(full_det))
        row_ids = row0 + jax.lax.broadcasted_iota(jnp.int32, (block_rows, 1), 0)
        det_mask = (row_ids >= n_main).astype(jnp.float32)

    x = x_ref[...]

    # ---- per-row-tile init (first hidden chunk only) ----
    @pl.when(k == 0)
    def _():
        acc_ref[...] = jnp.zeros_like(acc_ref)
        t2_ref[...] = jnp.zeros_like(t2_ref)

        @pl.when(has_det)
        def _():
            # x @ A_fc is chunk-independent: compute once per row tile.
            t1_ref[...] = jnp.dot(
                x, la1_ref[...], preferred_element_type=jnp.float32
            ).astype(t1_ref.dtype)

    # ---- fused c_fc -> quick_gelu -> partial c_proj for this hidden chunk ----
    base = jnp.dot(x, w1_ref[...], preferred_element_type=jnp.float32) + b1_ref[...]

    def det_chunk(mask):
        lora1 = jnp.dot(t1_ref[...], lb1_ref[...], preferred_element_type=jnp.float32)
        hv = base + (lora1 if mask is None else mask * lora1)
        h = _quick_gelu(hv).astype(jnp.bfloat16)
        acc_ref[...] += jnp.dot(h, w2_ref[...], preferred_element_type=jnp.float32)
        t2_ref[...] += jnp.dot(h, la2_ref[...], preferred_element_type=jnp.float32)

    def plain_chunk():
        h = _quick_gelu(base).astype(jnp.bfloat16)
        acc_ref[...] += jnp.dot(h, w2_ref[...], preferred_element_type=jnp.float32)

    if aligned:
        pl.when(full_det)(lambda: det_chunk(None))
        pl.when(jnp.logical_not(full_det))(plain_chunk)
    else:
        pl.when(full_det)(lambda: det_chunk(None))
        pl.when(straddle)(lambda: det_chunk(det_mask))
        pl.when(no_det)(plain_chunk)

    # ---- finalize on the last chunk: bias + proj-LoRA, single output write ----
    is_last = k == pl.num_programs(1) - 1

    def det_final(mask):
        lora2 = jnp.dot(
            t2_ref[...].astype(jnp.bfloat16), lb2_ref[...],
            preferred_element_type=jnp.float32,
        )
        y = acc_ref[...] + b2_ref[...] + (lora2 if mask is None else mask * lora2)
        out_ref[...] = y.astype(out_ref.dtype)

    def plain_final():
        out_ref[...] = (acc_ref[...] + b2_ref[...]).astype(out_ref.dtype)

    if aligned:
        pl.when(jnp.logical_and(is_last, full_det))(lambda: det_final(None))
        pl.when(jnp.logical_and(is_last, jnp.logical_not(full_det)))(plain_final)
    else:
        pl.when(jnp.logical_and(is_last, full_det))(lambda: det_final(None))
        pl.when(jnp.logical_and(is_last, straddle))(lambda: det_final(det_mask))
        pl.when(jnp.logical_and(is_last, no_det))(plain_final)


def _pick_block_rows(n_rows, n_main, target=256):
    """Prefer tiles that (a) end on the det boundary (no per-row mask) and
    (b) divide n_rows (no padding), without shrinking below 64 rows just for
    alignment.  Falls back to padding instead of one giant block."""
    g = math.gcd(n_rows, n_main) if n_main > 0 else n_rows
    for c in (target, 128, 64):
        if g % c == 0:
            return c
    for c in (target, 128, 64, 32, 16, 8):
        if n_rows % c == 0:
            return c
    return min(target, max(8, 8 * pl.cdiv(n_rows, 8)))   # rows get zero-padded


def _pick_block_h(H, target=512):
    if H <= target:
        return H
    for c in (target, 256, 128):
        if H % c == 0:
            return c
    return H  # odd hidden size: single unchunked pass


def transformer_mlp_with_lora(x, prep, det_token_num, *, block_rows=None, block_h=None):
    """x: (S, B, D); prep: output of prepare_params. Returns (S, B, D) in x.dtype."""
    S, B, D = x.shape
    H = prep["w1"].shape[1]
    R = prep["la1"].shape[1]
    n_rows = S * B
    # PyTorch quirk: with det_token_num == 0, x[-0:] is the WHOLE tensor, so
    # every row takes the LoRA path.
    n_main = 0 if det_token_num == 0 else (S - det_token_num) * B

    if block_rows is None:
        block_rows = _pick_block_rows(n_rows, n_main)
    if block_h is None:
        block_h = _pick_block_h(H)
    assert H % block_h == 0 and (block_h % 128 == 0 or block_h == H)
    assert block_rows % 8 == 0 or block_rows == n_rows

    n_rows_pad = block_rows * pl.cdiv(n_rows, block_rows)
    aligned = (n_main % block_rows == 0)
    grid = (n_rows_pad // block_rows, H // block_h)

    # bf16 at the pallas_call boundary halves x's HBM<->VMEM DMA traffic;
    # the MXU consumes bf16 anyway.  Padded rows are sliced off below.
    x2 = x.reshape(n_rows, D).astype(jnp.bfloat16)
    if n_rows_pad != n_rows:
        x2 = jnp.pad(x2, ((0, n_rows_pad - n_rows), (0, 0)))

    kernel = functools.partial(
        _mlp_lora_kernel, block_rows=block_rows, n_main=n_main, aligned=aligned)

    def resident(shape):
        # Constant-block operands: single-buffer (second buffer is pure waste).
        try:
            return pl.BlockSpec(shape, lambda i, k: (0, 0),
                                pipeline_mode=pl.Buffered(1))
        except TypeError:  # older jax without pipeline_mode support
            return pl.BlockSpec(shape, lambda i, k: (0, 0))

    # ---- VMEM budget, capped per generation (v7x: 64 MiB per TensorCore) ----
    est = (
        2 * block_rows * D * 2                                     # x tile (bf16, x2 buffers)
        + 2 * block_rows * D * 4                                   # out tile (f32, x2 buffers)
        + 2 * 2 * (D * block_h + block_h * D + R * block_h + block_h * R)  # chunked bf16 weights
        + 2 * block_h * 4                                          # b1 chunk
        + (D * R + R * D) * 2 + D * 4                              # resident la1/lb2/b2
        + block_rows * (D * 4 + R * 2 + R * 4)                     # acc / t1 / t2 scratch
        + (2 << 20)                                                # compiler temporaries
    )
    try:
        vmem_cap = pltpu.get_tpu_info().vmem_capacity_bytes
    except Exception:
        vmem_cap = 64 * 1024 * 1024                                # v7x-safe fallback
    vmem_limit = int(min(max(est, 32 * 1024 * 1024), vmem_cap - (8 << 20)))

    n_det_rows = n_rows - n_main
    cost = pl.CostEstimate(
        flops=int(4 * n_rows * D * H
                  + 2 * n_det_rows * (D * R + R * H + H * R + R * D)),
        transcendentals=int(n_rows * H),
        bytes_accessed=int(x2.size * 2 + n_rows * D * 4
                           + (D * H + H * D + D * R + R * H + H * R + R * D) * 2
                           + (H + D) * 4),
    )

    out = pl.pallas_call(
        kernel,
        out_shape=jax.ShapeDtypeStruct((n_rows_pad, D), x.dtype),
        grid_spec=pltpu.PrefetchScalarGridSpec(
            num_scalar_prefetch=0,
            grid=grid,
            in_specs=[
                pl.BlockSpec((block_rows, D), lambda i, k: (i, 0)),   # x row tile
                pl.BlockSpec((D, block_h), lambda i, k: (0, k)),      # w1 column chunk
                pl.BlockSpec((1, block_h), lambda i, k: (0, k)),      # b1 chunk
                pl.BlockSpec((block_h, D), lambda i, k: (k, 0)),      # w2 row chunk
                resident((1, D)),                                     # b2
                resident((D, R)),                                     # LoRA A (fc)
                pl.BlockSpec((R, block_h), lambda i, k: (0, k)),      # LoRA B*alpha (fc) chunk
                pl.BlockSpec((block_h, R), lambda i, k: (k, 0)),      # LoRA A (proj) chunk
                resident((R, D)),                                     # LoRA B*alpha (proj)
            ],
            out_specs=pl.BlockSpec((block_rows, D), lambda i, k: (i, 0)),
            scratch_shapes=[
                pltpu.VMEM((block_rows, D), jnp.float32),   # proj accumulator
                pltpu.VMEM((block_rows, R), jnp.bfloat16),  # x @ A_fc
                pltpu.VMEM((block_rows, R), jnp.float32),   # sum_k h_k @ A_proj[k]
            ],
        ),
        compiler_params=pltpu.CompilerParams(
            # Row tiles are independent ("parallel" -> megacore split on v7x);
            # the hidden-chunk axis accumulates into scratch ("arbitrary").
            dimension_semantics=("parallel", "arbitrary"),
            vmem_limit_bytes=vmem_limit,
        ),
        cost_estimate=cost,
    )(
        x2,
        prep["w1"], prep["b1"], prep["w2"], prep["b2"],
        prep["la1"], prep["lb1"], prep["la2"], prep["lb2"],
    )
    return out[:n_rows].reshape(S, B, D)


def make_params(key, d_model, rank=8):
    """Raw params mirroring the PyTorch module (Linear weights pre-transposed)."""
    d_hidden = 4 * d_model
    ks = jax.random.split(key, 8)
    std_dev = 1.0 / jnp.sqrt(jnp.float32(rank))
    return {
        "w_fc": jax.random.normal(ks[0], (d_model, d_hidden), jnp.float32) * 0.02,
        "b_fc": jax.random.normal(ks[1], (1, d_hidden), jnp.float32) * 0.01,
        "w_proj": jax.random.normal(ks[2], (d_hidden, d_model), jnp.float32) * 0.02,
        "b_proj": jax.random.normal(ks[3], (1, d_model), jnp.float32) * 0.01,
        # LoRA: A ~ randn / sqrt(rank).  B is zeros in the reference __init__,
        # but small random values here so the LoRA path is actually exercised.
        "A_fc": jax.random.normal(ks[4], (d_model, rank), jnp.float32) * std_dev,
        "B_fc": jax.random.normal(ks[5], (rank, d_hidden), jnp.float32) * 0.01,
        "A_proj": jax.random.normal(ks[6], (d_hidden, rank), jnp.float32) * std_dev,
        "B_proj": jax.random.normal(ks[7], (rank, d_model), jnp.float32) * 0.01,
    }


def prepare_params(params):
    """Kernel-ready params: bf16 MXU operands, alpha folded into LoRA B,
    LoRA rank zero-padded to a full 128-lane width, f32 biases."""
    r = params["A_fc"].shape[1]
    r_pad = max(LORA_LANES, LORA_LANES * ((r + LORA_LANES - 1) // LORA_LANES))
    pad_cols = lambda a: jnp.pad(a, ((0, 0), (0, r_pad - r)))
    pad_rows = lambda a: jnp.pad(a, ((0, r_pad - r), (0, 0)))
    return {
        "w1": params["w_fc"].astype(jnp.bfloat16),
        "b1": params["b_fc"].astype(jnp.float32),
        "w2": params["w_proj"].astype(jnp.bfloat16),
        "b2": params["b_proj"].astype(jnp.float32),
        "la1": pad_cols(params["A_fc"]).astype(jnp.bfloat16),
        "lb1": pad_rows(ALPHA * params["B_fc"]).astype(jnp.bfloat16),
        "la2": pad_cols(params["A_proj"]).astype(jnp.bfloat16),
        "lb2": pad_rows(ALPHA * params["B_proj"]).astype(jnp.bfloat16),
    }


def reference_forward(x, prep, det_token_num):
    """Pure-JAX reference mirroring the PyTorch forward with the kernel's dtypes."""
    S, B, D = x.shape
    n_main = 0 if det_token_num == 0 else (S - det_token_num) * B
    rows = x.reshape(-1, D).astype(jnp.bfloat16)
    mask = (jnp.arange(rows.shape[0])[:, None] >= n_main).astype(jnp.float32)

    h = jnp.dot(rows, prep["w1"], preferred_element_type=jnp.float32) + prep["b1"]
    t1 = jnp.dot(rows, prep["la1"], preferred_element_type=jnp.float32).astype(jnp.bfloat16)
    h = h + mask * jnp.dot(t1, prep["lb1"], preferred_element_type=jnp.float32)
    h = _quick_gelu(h).astype(jnp.bfloat16)

    y = jnp.dot(h, prep["w2"], preferred_element_type=jnp.float32) + prep["b2"]
    t2 = jnp.dot(h, prep["la2"], preferred_element_type=jnp.float32).astype(jnp.bfloat16)
    y = y + mask * jnp.dot(t2, prep["lb2"], preferred_element_type=jnp.float32)
    return y.reshape(S, B, D).astype(x.dtype)


if __name__ == "__main__":
    d_model = 128        # lane-dense (multiple of 128) model width
    rank = 8             # zero-padded to 128 lanes inside prepare_params
    det_token_num = 4
    seq, batch = 32, 2   # 64 rows total; det boundary at row 56

    key = jax.random.PRNGKey(0)
    kx, kp = jax.random.split(key)
    x = jax.random.normal(kx, (seq, batch, d_model), jnp.float32)
    raw = make_params(kp, d_model, rank)
    prep = prepare_params(raw)

    ref = reference_forward(x, prep, det_token_num)

    # Exercise: auto tiling, det-aligned tiles + hidden chunking, and the
    # padded / straddling-tile fallback.
    configs = [
        dict(block_rows=None, block_h=None),   # auto pick
        dict(block_rows=8, block_h=256),       # det-boundary-aligned tiles, 2 hidden chunks
        dict(block_rows=48, block_h=512),      # 64 % 48 != 0 -> row padding + masked straddle tile
    ]
    for cfg in configs:
        out = jax.block_until_ready(
            transformer_mlp_with_lora(x, prep, det_token_num, **cfg))
        assert out.shape == (seq, batch, d_model)
        err = float(jnp.max(jnp.abs(out - ref)))
        assert jnp.allclose(out, ref, atol=1e-3, rtol=1e-3), f"{cfg}: mismatch ({err})"

    # PyTorch det_token_num == 0 quirk: every row takes the LoRA path.
    out0 = jax.block_until_ready(transformer_mlp_with_lora(x, prep, 0))
    assert jnp.allclose(out0, reference_forward(x, prep, 0), atol=1e-3, rtol=1e-3)

    # Non-aligned boundary with a fully-det tile (covers the remaining branch).
    out6 = jax.block_until_ready(
        transformer_mlp_with_lora(x, prep, 6, block_rows=8, block_h=256))
    assert jnp.allclose(out6, reference_forward(x, prep, 6), atol=1e-3, rtol=1e-3)

    print("KERNEL_OK")
</pallas_src>

<mosaic_0001>
module attributes {stable_mosaic.version = 11 : i64} {
  func.func @_mlp_lora_kernel(%arg0: i32, %arg1: i32, %arg2: memref<64x128xbf16, #tpu.memory_space<vmem>>, %arg3: memref<128x512xbf16, #tpu.memory_space<vmem>>, %arg4: memref<1x512xf32, #tpu.memory_space<vmem>>, %arg5: memref<512x128xbf16, #tpu.memory_space<vmem>>, %arg6: memref<1x128xf32, #tpu.memory_space<vmem>>, %arg7: memref<128x128xbf16, #tpu.memory_space<vmem>>, %arg8: memref<128x512xbf16, #tpu.memory_space<vmem>>, %arg9: memref<512x128xbf16, #tpu.memory_space<vmem>>, %arg10: memref<128x128xbf16, #tpu.memory_space<vmem>>, %arg11: memref<64x128xf32, #tpu.memory_space<vmem>>, %arg12: memref<64x128xf32, #tpu.memory_space<vmem>>, %arg13: memref<64x128xbf16, #tpu.memory_space<vmem>>, %arg14: memref<64x128xf32, #tpu.memory_space<vmem>>) attributes {dimension_semantics = [#tpu.dimension_semantics<parallel>, #tpu.dimension_semantics<arbitrary>], iteration_bounds = array<i64: 1, 1>, scalar_prefetch = 0 : i64, scratch_operands = 3 : i64, tpu.core_type = #tpu.core_type<tc>, window_params = [{transform_indices = @transform_0, window_bounds = array<i64: 64, 128>}, {transform_indices = @transform_1, window_bounds = array<i64: 128, 512>}, {transform_indices = @transform_2, window_bounds = array<i64: 1, 512>}, {transform_indices = @transform_3, window_bounds = array<i64: 512, 128>}, {pipeline_mode = #tpu.pipeline_mode<synchronous>, transform_indices = @transform_4, window_bounds = array<i64: 1, 128>}, {pipeline_mode = #tpu.pipeline_mode<synchronous>, transform_indices = @transform_5, window_bounds = array<i64: 128, 128>}, {transform_indices = @transform_6, window_bounds = array<i64: 128, 512>}, {transform_indices = @transform_7, window_bounds = array<i64: 512, 128>}, {pipeline_mode = #tpu.pipeline_mode<synchronous>, transform_indices = @transform_8, window_bounds = array<i64: 128, 128>}, {transform_indices = @transform_9, window_bounds = array<i64: 64, 128>}]} {
    %c64_i32 = arith.constant 64 : i32
    %0 = arith.muli %arg0, %c64_i32 : i32
    %c56_i32 = arith.constant 56 : i32
    %1 = arith.cmpi sge, %0, %c56_i32 : i32
    %c64_i32_0 = arith.constant 64 : i32
    %2 = arith.addi %0, %c64_i32_0 : i32
    %c56_i32_1 = arith.constant 56 : i32
    %3 = arith.cmpi sgt, %2, %c56_i32_1 : i32
    %true = arith.constant true
    %4 = arith.xori %3, %true : i1
    %true_2 = arith.constant true
    %5 = arith.xori %1, %true_2 : i1
    %6 = arith.andi %3, %5 : i1
    %7 = tpu.iota {dimensions = array<i32: 0>} : vector<64x1xi32>
    %8 = vector.broadcast %0 : i32 to vector<64x1xi32>
    %9 = arith.addi %8, %7 : vector<64x1xi32>
    %c56_i32_3 = arith.constant 56 : i32
    %10 = vector.broadcast %c56_i32_3 : i32 to vector<64x1xi32>
    %11 = arith.cmpi sge, %9, %10 : vector<64x1xi32>
    %12 = arith.extui %11 : vector<64x1xi1> to vector<64x1xi32>
    %13 = arith.sitofp %12 : vector<64x1xi32> to vector<64x1xf32>
    %c0 = arith.constant 0 : index
    %c0_4 = arith.constant 0 : index
    %14 = vector.load %arg2[%c0, %c0_4] : memref<64x128xbf16, #tpu.memory_space<vmem>>, vector<64x128xbf16>
    %c0_i32 = arith.constant 0 : i32
    %15 = arith.cmpi eq, %arg1, %c0_i32 : i32
    %16 = arith.extui %15 : i1 to i32
    %c0_i32_5 = arith.constant 0 : i32
    %17 = arith.cmpi ne, %16, %c0_i32_5 : i32
    scf.if %17 {
      %cst_17 = arith.constant 0.000000e+00 : f32
      %39 = vector.broadcast %cst_17 : f32 to vector<64x128xf32>
      %c0_18 = arith.constant 0 : index
      %c0_19 = arith.constant 0 : index
      %40 = vector.load %arg12[%c0_18, %c0_19] : memref<64x128xf32, #tpu.memory_space<vmem>>, vector<64x128xf32>
      tpu.vector_store %arg12[%c0_18, %c0_19], %39 {strides = array<i32>} : memref<64x128xf32, #tpu.memory_space<vmem>>, vector<64x128xf32>,
      %cst_20 = arith.constant 0.000000e+00 : f32
      %41 = vector.broadcast %cst_20 : f32 to vector<64x128xf32>
      %c0_21 = arith.constant 0 : index
      %c0_22 = arith.constant 0 : index
      %42 = vector.load %arg14[%c0_21, %c0_22] : memref<64x128xf32, #tpu.memory_space<vmem>>, vector<64x128xf32>
      tpu.vector_store %arg14[%c0_21, %c0_22], %41 {strides = array<i32>} : memref<64x128xf32, #tpu.memory_space<vmem>>, vector<64x128xf32>,
      %43 = arith.extui %3 : i1 to i32
      %c0_i32_23 = arith.constant 0 : i32
      %44 = arith.cmpi ne, %43, %c0_i32_23 : i32
      scf.if %44 {
        %c0_24 = arith.constant 0 : index
        %c0_25 = arith.constant 0 : index
        %45 = vector.load %arg7[%c0_24, %c0_25] : memref<128x128xbf16, #tpu.memory_space<vmem>>, vector<128x128xbf16>
        %cst_26 = arith.constant dense<0.000000e+00> : vector<64x128xf32>
        %46 = tpu.matmul %14, %45, %cst_26 {dimension_numbers = #tpu.dot_dimension_numbers<[1], [0], [0], [1], [0, 0, 1, 1], [], []>} : vector<64x128xbf16>, vector<128x128xbf16>, vector<64x128xf32> -> vector<64x128xf32>
        %47 = arith.truncf %46 : vector<64x128xf32> to vector<64x128xbf16>
        %c0_27 = arith.constant 0 : index
        %c0_28 = arith.constant 0 : index
        %48 = vector.load %arg13[%c0_27, %c0_28] : memref<64x128xbf16, #tpu.memory_space<vmem>>, vector<64x128xbf16>
        tpu.vector_store %arg13[%c0_27, %c0_28], %47 {strides = array<i32>} : memref<64x128xbf16, #tpu.memory_space<vmem>>, vector<64x128xbf16>,
      } else {
      }
    } else {
    }
    %c0_6 = arith.constant 0 : index
    %c0_7 = arith.constant 0 : index
    %18 = vector.load %arg3[%c0_6, %c0_7] : memref<128x512xbf16, #tpu.memory_space<vmem>>, vector<128x512xbf16>
    %cst = arith.constant dense<0.000000e+00> : vector<64x512xf32>
    %19 = tpu.matmul %14, %18, %cst {dimension_numbers = #tpu.dot_dimension_numbers<[1], [0], [0], [1], [0, 0, 1, 1], [], []>} : vector<64x128xbf16>, vector<128x512xbf16>, vector<64x512xf32> -> vector<64x512xf32>
    %c0_8 = arith.constant 0 : index
    %c0_9 = arith.constant 0 : index
    %20 = vector.load %arg4[%c0_8, %c0_9] : memref<1x512xf32, #tpu.memory_space<vmem>>, vector<1x512xf32>
    %21 = vector.broadcast %20 : vector<1x512xf32> to vector<64x512xf32>
    %22 = arith.addf %19, %21 : vector<64x512xf32>
    %23 = arith.extui %1 : i1 to i32
    %c0_i32_10 = arith.constant 0 : i32
    %24 = arith.cmpi ne, %23, %c0_i32_10 : i32
    scf.if %24 {
      %c0_17 = arith.constant 0 : index
      %c0_18 = arith.constant 0 : index
      %39 = vector.load %arg13[%c0_17, %c0_18] : memref<64x128xbf16, #tpu.memory_space<vmem>>, vector<64x128xbf16>
      %c0_19 = arith.constant 0 : index
      %c0_20 = arith.constant 0 : index
      %40 = vector.load %arg8[%c0_19, %c0_20] : memref<128x512xbf16, #tpu.memory_space<vmem>>, vector<128x512xbf16>
      %cst_21 = arith.constant dense<0.000000e+00> : vector<64x512xf32>
      %41 = tpu.matmul %39, %40, %cst_21 {dimension_numbers = #tpu.dot_dimension_numbers<[1], [0], [0], [1], [0, 0, 1, 1], [], []>} : vector<64x128xbf16>, vector<128x512xbf16>, vector<64x512xf32> -> vector<64x512xf32>
      %42 = arith.addf %22, %41 : vector<64x512xf32>
      %cst_22 = arith.constant 1.702000e+00 : f32
      %43 = vector.broadcast %cst_22 : f32 to vector<64x512xf32>
      %44 = arith.mulf %43, %42 : vector<64x512xf32>
      %45 = arith.negf %44 : vector<64x512xf32>
      %46 = math.exp %45 : vector<64x512xf32>
      %cst_23 = arith.constant 1.000000e+00 : f32
      %47 = vector.broadcast %cst_23 : f32 to vector<64x512xf32>
      %48 = arith.addf %47, %46 : vector<64x512xf32>
      %49 = arith.divf %47, %48 : vector<64x512xf32>
      %50 = arith.mulf %42, %49 : vector<64x512xf32>
      %51 = arith.truncf %50 : vector<64x512xf32> to vector<64x512xbf16>
      %c0_24 = arith.constant 0 : index
      %c0_25 = arith.constant 0 : index
      %52 = vector.load %arg12[%c0_24, %c0_25] : memref<64x128xf32, #tpu.memory_space<vmem>>, vector<64x128xf32>
      %c0_26 = arith.constant 0 : index
      %c0_27 = arith.constant 0 : index
      %53 = vector.load %arg5[%c0_26, %c0_27] : memref<512x128xbf16, #tpu.memory_space<vmem>>, vector<512x128xbf16>
      %cst_28 = arith.constant dense<0.000000e+00> : vector<64x128xf32>
      %54 = tpu.matmul %51, %53, %cst_28 {dimension_numbers = #tpu.dot_dimension_numbers<[1], [0], [0], [1], [0, 0, 1, 1], [], []>} : vector<64x512xbf16>, vector<512x128xbf16>, vector<64x128xf32> -> vector<64x128xf32>
      %55 = arith.addf %52, %54 : vector<64x128xf32>
      %c0_29 = arith.constant 0 : index
      %c0_30 = arith.constant 0 : index
      %56 = vector.load %arg12[%c0_29, %c0_30] : memref<64x128xf32, #tpu.memory_space<vmem>>, vector<64x128xf32>
      tpu.vector_store %arg12[%c0_29, %c0_30], %55 {strides = array<i32>} : memref<64x128xf32, #tpu.memory_space<vmem>>, vector<64x128xf32>,
      %c0_31 = arith.constant 0 : index
      %c0_32 = arith.constant 0 : index
      %57 = vector.load %arg14[%c0_31, %c0_32] : memref<64x128xf32, #tpu.memory_space<vmem>>, vector<64x128xf32>
      %c0_33 = arith.constant 0 : index
      %c0_34 = arith.constant 0 : index
      %58 = vector.load %arg9[%c0_33, %c0_34] : memref<512x128xbf16, #tpu.memory_space<vmem>>, vector<512x128xbf16>
      %cst_35 = arith.constant dense<0.000000e+00> : vector<64x128xf32>
      %59 = tpu.matmul %51, %58, %cst_35 {dimension_numbers = #tpu.dot_dimension_numbers<[1], [0], [0], [1], [0, 0, 1, 1], [], []>} : vector<64x512xbf16>, vector<512x128xbf16>, vector<64x128xf32> -> vector<64x128xf32>
      %60 = arith.addf %57, %59 : vector<64x128xf32>
      %c0_36 = arith.constant 0 : index
      %c0_37 = arith.constant 0 : index
      %61 = vector.load %arg14[%c0_36, %c0_37] : memref<64x128xf32, #tpu.memory_space<vmem>>, vector<64x128xf32>
      tpu.vector_store %arg14[%c0_36, %c0_37], %60 {strides = array<i32>} : memref<64x128xf32, #tpu.memory_space<vmem>>, vector<64x128xf32>,
    } else {
    }
    %25 = arith.extui %6 : i1 to i32
    %c0_i32_11 = arith.constant 0 : i32
    %26 = arith.cmpi ne, %25, %c0_i32_11 : i32
    scf.if %26 {
      %c0_17 = arith.constant 0 : index
      %c0_18 = arith.constant 0 : index
      %39 = vector.load %arg13[%c0_17, %c0_18] : memref<64x128xbf16, #tpu.memory_space<vmem>>, vector<64x128xbf16>
      %c0_19 = arith.constant 0 : index
      %c0_20 = arith.constant 0 : index
      %40 = vector.load %arg8[%c0_19, %c0_20] : memref<128x512xbf16, #tpu.memory_space<vmem>>, vector<128x512xbf16>
      %cst_21 = arith.constant dense<0.000000e+00> : vector<64x512xf32>
      %41 = tpu.matmul %39, %40, %cst_21 {dimension_numbers = #tpu.dot_dimension_numbers<[1], [0], [0], [1], [0, 0, 1, 1], [], []>} : vector<64x128xbf16>, vector<128x512xbf16>, vector<64x512xf32> -> vector<64x512xf32>
      %42 = vector.broadcast %13 : vector<64x1xf32> to vector<64x512xf32>
      %43 = arith.mulf %42, %41 : vector<64x512xf32>
      %44 = arith.addf %22, %43 : vector<64x512xf32>
      %cst_22 = arith.constant 1.702000e+00 : f32
      %45 = vector.broadcast %cst_22 : f32 to vector<64x512xf32>
      %46 = arith.mulf %45, %44 : vector<64x512xf32>
      %47 = arith.negf %46 : vector<64x512xf32>
      %48 = math.exp %47 : vector<64x512xf32>
      %cst_23 = arith.constant 1.000000e+00 : f32
      %49 = vector.broadcast %cst_23 : f32 to vector<64x512xf32>
      %50 = arith.addf %49, %48 : vector<64x512xf32>
      %51 = arith.divf %49, %50 : vector<64x512xf32>
      %52 = arith.mulf %44, %51 : vector<64x512xf32>
      %53 = arith.truncf %52 : vector<64x512xf32> to vector<64x512xbf16>
      %c0_24 = arith.constant 0 : index
      %c0_25 = arith.constant 0 : index
      %54 = vector.load %arg12[%c0_24, %c0_25] : memref<64x128xf32, #tpu.memory_space<vmem>>, vector<64x128xf32>
      %c0_26 = arith.constant 0 : index
      %c0_27 = arith.constant 0 : index
      %55 = vector.load %arg5[%c0_26, %c0_27] : memref<512x128xbf16, #tpu.memory_space<vmem>>, vector<512x128xbf16>
      %cst_28 = arith.constant dense<0.000000e+00> : vector<64x128xf32>
      %56 = tpu.matmul %53, %55, %cst_28 {dimension_numbers = #tpu.dot_dimension_numbers<[1], [0], [0], [1], [0, 0, 1, 1], [], []>} : vector<64x512xbf16>, vector<512x128xbf16>, vector<64x128xf32> -> vector<64x128xf32>
      %57 = arith.addf %54, %56 : vector<64x128xf32>
      %c0_29 = arith.constant 0 : index
      %c0_30 = arith.constant 0 : index
      %58 = vector.load %arg12[%c0_29, %c0_30] : memref<64x128xf32, #tpu.memory_space<vmem>>, vector<64x128xf32>
      tpu.vector_store %arg12[%c0_29, %c0_30], %57 {strides = array<i32>} : memref<64x128xf32, #tpu.memory_space<vmem>>, vector<64x128xf32>,
      %c0_31 = arith.constant 0 : index
      %c0_32 = arith.constant 0 : index
      %59 = vector.load %arg14[%c0_31, %c0_32] : memref<64x128xf32, #tpu.memory_space<vmem>>, vector<64x128xf32>
      %c0_33 = arith.constant 0 : index
      %c0_34 = arith.constant 0 : index
      %60 = vector.load %arg9[%c0_33, %c0_34] : memref<512x128xbf16, #tpu.memory_space<vmem>>, vector<512x128xbf16>
      %cst_35 = arith.constant dense<0.000000e+00> : vector<64x128xf32>
      %61 = tpu.matmul %53, %60, %cst_35 {dimension_numbers = #tpu.dot_dimension_numbers<[1], [0], [0], [1], [0, 0, 1, 1], [], []>} : vector<64x512xbf16>, vector<512x128xbf16>, vector<64x128xf32> -> vector<64x128xf32>
      %62 = arith.addf %59, %61 : vector<64x128xf32>
      %c0_36 = arith.constant 0 : index
      %c0_37 = arith.constant 0 : index
      %63 = vector.load %arg14[%c0_36, %c0_37] : memref<64x128xf32, #tpu.memory_space<vmem>>, vector<64x128xf32>
      tpu.vector_store %arg14[%c0_36, %c0_37], %62 {strides = array<i32>} : memref<64x128xf32, #tpu.memory_space<vmem>>, vector<64x128xf32>,
    } else {
    }
    %27 = arith.extui %4 : i1 to i32
    %c0_i32_12 = arith.constant 0 : i32
    %28 = arith.cmpi ne, %27, %c0_i32_12 : i32
    scf.if %28 {
      %cst_17 = arith.constant 1.702000e+00 : f32
      %39 = vector.broadcast %cst_17 : f32 to vector<64x512xf32>
      %40 = arith.mulf %39, %22 : vector<64x512xf32>
      %41 = arith.negf %40 : vector<64x512xf32>
      %42 = math.exp %41 : vector<64x512xf32>
      %cst_18 = arith.constant 1.000000e+00 : f32
      %43 = vector.broadcast %cst_18 : f32 to vector<64x512xf32>
      %44 = arith.addf %43, %42 : vector<64x512xf32>
      %45 = arith.divf %43, %44 : vector<64x512xf32>
      %46 = arith.mulf %22, %45 : vector<64x512xf32>
      %47 = arith.truncf %46 : vector<64x512xf32> to vector<64x512xbf16>
      %c0_19 = arith.constant 0 : index
      %c0_20 = arith.constant 0 : index
      %48 = vector.load %arg12[%c0_19, %c0_20] : memref<64x128xf32, #tpu.memory_space<vmem>>, vector<64x128xf32>
      %c0_21 = arith.constant 0 : index
      %c0_22 = arith.constant 0 : index
      %49 = vector.load %arg5[%c0_21, %c0_22] : memref<512x128xbf16, #tpu.memory_space<vmem>>, vector<512x128xbf16>
      %cst_23 = arith.constant dense<0.000000e+00> : vector<64x128xf32>
      %50 = tpu.matmul %47, %49, %cst_23 {dimension_numbers = #tpu.dot_dimension_numbers<[1], [0], [0], [1], [0, 0, 1, 1], [], []>} : vector<64x512xbf16>, vector<512x128xbf16>, vector<64x128xf32> -> vector<64x128xf32>
      %51 = arith.addf %48, %50 : vector<64x128xf32>
      %c0_24 = arith.constant 0 : index
      %c0_25 = arith.constant 0 : index
      %52 = vector.load %arg12[%c0_24, %c0_25] : memref<64x128xf32, #tpu.memory_space<vmem>>, vector<64x128xf32>
      tpu.vector_store %arg12[%c0_24, %c0_25], %51 {strides = array<i32>} : memref<64x128xf32, #tpu.memory_space<vmem>>, vector<64x128xf32>,
    } else {
    }
    %c0_i32_13 = arith.constant 0 : i32
    %29 = arith.cmpi eq, %arg1, %c0_i32_13 : i32
    %30 = arith.andi %29, %1 : i1
    %31 = arith.extui %30 : i1 to i32
    %c0_i32_14 = arith.constant 0 : i32
    %32 = arith.cmpi ne, %31, %c0_i32_14 : i32
    scf.if %32 {
      %c0_17 = arith.constant 0 : index
      %c0_18 = arith.constant 0 : index
      %39 = vector.load %arg14[%c0_17, %c0_18] : memref<64x128xf32, #tpu.memory_space<vmem>>, vector<64x128xf32>
      %40 = arith.truncf %39 : vector<64x128xf32> to vector<64x128xbf16>
      %c0_19 = arith.constant 0 : index
      %c0_20 = arith.constant 0 : index
      %41 = vector.load %arg10[%c0_19, %c0_20] : memref<128x128xbf16, #tpu.memory_space<vmem>>, vector<128x128xbf16>
      %cst_21 = arith.constant dense<0.000000e+00> : vector<64x128xf32>
      %42 = tpu.matmul %40, %41, %cst_21 {dimension_numbers = #tpu.dot_dimension_numbers<[1], [0], [0], [1], [0, 0, 1, 1], [], []>} : vector<64x128xbf16>, vector<128x128xbf16>, vector<64x128xf32> -> vector<64x128xf32>
      %c0_22 = arith.constant 0 : index
      %c0_23 = arith.constant 0 : index
      %43 = vector.load %arg12[%c0_22, %c0_23] : memref<64x128xf32, #tpu.memory_space<vmem>>, vector<64x128xf32>
      %c0_24 = arith.constant 0 : index
      %c0_25 = arith.constant 0 : index
      %44 = vector.load %arg6[%c0_24, %c0_25] : memref<1x128xf32, #tpu.memory_space<vmem>>, vector<1x128xf32>
      %45 = vector.broadcast %44 : vector<1x128xf32> to vector<64x128xf32>
      %46 = arith.addf %43, %45 : vector<64x128xf32>
      %47 = arith.addf %46, %42 : vector<64x128xf32>
      %c0_26 = arith.constant 0 : index
      %c0_27 = arith.constant 0 : index
      %48 = vector.load %arg11[%c0_26, %c0_27] : memref<64x128xf32, #tpu.memory_space<vmem>>, vector<64x128xf32>
      tpu.vector_store %arg11[%c0_26, %c0_27], %47 {strides = array<i32>} : memref<64x128xf32, #tpu.memory_space<vmem>>, vector<64x128xf32>,
    } else {
    }
    %33 = arith.andi %29, %6 : i1
    %34 = arith.extui %33 : i1 to i32
    %c0_i32_15 = arith.constant 0 : i32
    %35 = arith.cmpi ne, %34, %c0_i32_15 : i32
    scf.if %35 {
      %c0_17 = arith.constant 0 : index
      %c0_18 = arith.constant 0 : index
      %39 = vector.load %arg14[%c0_17, %c0_18] : memref<64x128xf32, #tpu.memory_space<vmem>>, vector<64x128xf32>
      %40 = arith.truncf %39 : vector<64x128xf32> to vector<64x128xbf16>
      %c0_19 = arith.constant 0 : index
      %c0_20 = arith.constant 0 : index
      %41 = vector.load %arg10[%c0_19, %c0_20] : memref<128x128xbf16, #tpu.memory_space<vmem>>, vector<128x128xbf16>
      %cst_21 = arith.constant dense<0.000000e+00> : vector<64x128xf32>
      %42 = tpu.matmul %40, %41, %cst_21 {dimension_numbers = #tpu.dot_dimension_numbers<[1], [0], [0], [1], [0, 0, 1, 1], [], []>} : vector<64x128xbf16>, vector<128x128xbf16>, vector<64x128xf32> -> vector<64x128xf32>
      %c0_22 = arith.constant 0 : index
      %c0_23 = arith.constant 0 : index
      %43 = vector.load %arg12[%c0_22, %c0_23] : memref<64x128xf32, #tpu.memory_space<vmem>>, vector<64x128xf32>
      %c0_24 = arith.constant 0 : index
      %c0_25 = arith.constant 0 : index
      %44 = vector.load %arg6[%c0_24, %c0_25] : memref<1x128xf32, #tpu.memory_space<vmem>>, vector<1x128xf32>
      %45 = vector.broadcast %44 : vector<1x128xf32> to vector<64x128xf32>
      %46 = arith.addf %43, %45 : vector<64x128xf32>
      %47 = vector.broadcast %13 : vector<64x1xf32> to vector<64x128xf32>
      %48 = arith.mulf %47, %42 : vector<64x128xf32>
      %49 = arith.addf %46, %48 : vector<64x128xf32>
      %c0_26 = arith.constant 0 : index
      %c0_27 = arith.constant 0 : index
      %50 = vector.load %arg11[%c0_26, %c0_27] : memref<64x128xf32, #tpu.memory_space<vmem>>, vector<64x128xf32>
      tpu.vector_store %arg11[%c0_26, %c0_27], %49 {strides = array<i32>} : memref<64x128xf32, #tpu.memory_space<vmem>>, vector<64x128xf32>,
    } else {
    }
    %36 = arith.andi %29, %4 : i1
    %37 = arith.extui %36 : i1 to i32
    %c0_i32_16 = arith.constant 0 : i32
    %38 = arith.cmpi ne, %37, %c0_i32_16 : i32
    scf.if %38 {
      %c0_17 = arith.constant 0 : index
      %c0_18 = arith.constant 0 : index
      %39 = vector.load %arg12[%c0_17, %c0_18] : memref<64x128xf32, #tpu.memory_space<vmem>>, vector<64x128xf32>
      %c0_19 = arith.constant 0 : index
      %c0_20 = arith.constant 0 : index
      %40 = vector.load %arg6[%c0_19, %c0_20] : memref<1x128xf32, #tpu.memory_space<vmem>>, vector<1x128xf32>
      %41 = vector.broadcast %40 : vector<1x128xf32> to vector<64x128xf32>
      %42 = arith.addf %39, %41 : vector<64x128xf32>
      %c0_21 = arith.constant 0 : index
      %c0_22 = arith.constant 0 : index
      %43 = vector.load %arg11[%c0_21, %c0_22] : memref<64x128xf32, #tpu.memory_space<vmem>>, vector<64x128xf32>
      tpu.vector_store %arg11[%c0_21, %c0_22], %42 {strides = array<i32>} : memref<64x128xf32, #tpu.memory_space<vmem>>, vector<64x128xf32>,
    } else {
    }
    return
  }
  func.func @transform_0(%arg0: i32, %arg1: i32) -> (i32, i32) {
    %c0_i32 = arith.constant 0 : i32
    %c0_i32_0 = arith.constant 0 : i32
    return %arg0, %c0_i32 : i32, i32
  }
  func.func @transform_1(%arg0: i32, %arg1: i32) -> (i32, i32) {
    %c0_i32 = arith.constant 0 : i32
    %c0_i32_0 = arith.constant 0 : i32
    return %c0_i32, %arg1 : i32, i32
  }
  func.func @transform_2(%arg0: i32, %arg1: i32) -> (i32, i32) {
    %c0_i32 = arith.constant 0 : i32
    %c0_i32_0 = arith.constant 0 : i32
    return %c0_i32, %arg1 : i32, i32
  }
  func.func @transform_3(%arg0: i32, %arg1: i32) -> (i32, i32) {
    %c0_i32 = arith.constant 0 : i32
    %c0_i32_0 = arith.constant 0 : i32
    return %arg1, %c0_i32 : i32, i32
  }
  func.func @transform_4(%arg0: i32, %arg1: i32) -> (i32, i32) {
    %c0_i32 = arith.constant 0 : i32
    %c0_i32_0 = arith.constant 0 : i32
    %c0_i32_1 = arith.constant 0 : i32
    return %c0_i32, %c0_i32_0 : i32, i32
  }
  func.func @transform_5(%arg0: i32, %arg1: i32) -> (i32, i32) {
    %c0_i32 = arith.constant 0 : i32
    %c0_i32_0 = arith.constant 0 : i32
    %c0_i32_1 = arith.constant 0 : i32
    return %c0_i32, %c0_i32_0 : i32, i32
  }
  func.func @transform_6(%arg0: i32, %arg1: i32) -> (i32, i32) {
    %c0_i32 = arith.constant 0 : i32
    %c0_i32_0 = arith.constant 0 : i32
    return %c0_i32, %arg1 : i32, i32
  }
  func.func @transform_7(%arg0: i32, %arg1: i32) -> (i32, i32) {
    %c0_i32 = arith.constant 0 : i32
    %c0_i32_0 = arith.constant 0 : i32
    return %arg1, %c0_i32 : i32, i32
  }
  func.func @transform_8(%arg0: i32, %arg1: i32) -> (i32, i32) {
    %c0_i32 = arith.constant 0 : i32
    %c0_i32_0 = arith.constant 0 : i32
    %c0_i32_1 = arith.constant 0 : i32
    return %c0_i32, %c0_i32_0 : i32, i32
  }
  func.func @transform_9(%arg0: i32, %arg1: i32) -> (i32, i32) {
    %c0_i32 = arith.constant 0 : i32
    %c0_i32_0 = arith.constant 0 : i32
    return %arg0, %c0_i32 : i32, i32
  }
}

</mosaic_0001>

<bundles_post_ra>
// kernel: tpu_custom_call.1
= control target key start
LH: loop header
LB: loop body
LE: loop exit
PB: predicated region body
PF: predicated region fallthrough
CT: control target
= control target key end

     0   :  { %14 = vsyncpa [#allocation6], 0  ;;  %s6606_s0 = inlined_call_operand.hbm [shape: bf16[64,128], index: 0, kind: input, shape index: {}]   ;;  %s6607_s1 = inlined_call_operand.hbm [shape: bf16[128,512], index: 1, kind: input, shape index: {}]   ;;  %s6608_s2 = inlined_call_operand.vmem [shape: f32[1,512], index: 2, kind: input, shape index: {}]   ;;  %s6609_s3 = inlined_call_operand.hbm [shape: bf16[512,128], index: 3, kind: input, shape index: {}]   ;;  %s6610_s4 = inlined_call_operand.vmem [shape: f32[1,128], index: 4, kind: input, shape index: {}]   ;;  %s6611_s5 = inlined_call_operand.hbm [shape: bf16[128,128], index: 5, kind: input, shape index: {}]   ;;  %s6612_s6 = inlined_call_operand.hbm [shape: bf16[128,512], index: 6, kind: input, shape index: {}]   ;;  %s6613_s7 = inlined_call_operand.hbm [shape: bf16[512,128], index: 7, kind: input, shape index: {}]   ;;  %s6614_s8 = inlined_call_operand.hbm [shape: bf16[128,128], index: 8, kind: input, shape index: {}]   ;;  %s6615_s9 = inlined_call_operand.hbm [shape: f32[64,128], index: 9, kind: output, shape index: {}]  }
   0x1   :  { %15 = vsyncpa [#allocation9], 0 }
   0x2   :  { %16 = vsyncpa [#allocation12], 0 }
   0x3   :  { %17 = vsyncpa [#allocation15], 0 }
   0x4   :  { %18 = vsyncpa [#allocation7], 0  ;;  %s5968_s30 = smov [#allocation8]   ;;  %s5782_s13 = scalar_lea.hbm %s6607_s1, 4096 }
   0x5   :  { %s36_s10 = sshll.u32 %s5968_s30, 4  ;;  %p5783_p0 = scmp.ne.s32.totalorder %s6607_s1, %s5782_s13  ;;  %s37_s10 = int_to_ptr.vmem [resolvable:$true] %s36_s10 }
   0x6   :  { %p5786_p1 = scmp.lt.u32.totalorder %s5782_s13, %s6607_s1 }
   0x8   :  { %p5788_p2 = pnand %p5786_p1, %p5783_p0 }
   0xa   :  { %5791 = shalt.err (!%p5788_p2)
}
   0xb   :  { %s5792_s18 = scalar_lea.vmem %s37_s10, 4096  ;;  %p5797_p4 = scmp.lt.s32.totalorder %s37_s10, %s37_s10 }
   0xc   :  { %p5793_p3 = scmp.ne.s32.totalorder %s37_s10, %s5792_s18  ;;  %p5798_p5 = scmp.lt.s32.totalorder %s5792_s18, %s5792_s18 }
   0xe   :  { %p5799_p6 = por %p5798_p5, %p5797_p4 }
  0x10   :  { %p5800_p7 = pnand %p5799_p6, %p5793_p3 }
  0x12   :  { %5803 = shalt.err (!%p5800_p7)
}
  0x13   :  { %s5969_s19 = smov 256   ;;  %s5970_s20 = smov 16  }
  0x14   :  { %42 = dma.hbm_to_vmem [thread:$0]  %s6607_s1, 4096, %s37_s10, [#allocation9], %s5969_s19, %s5969_s19, %s5970_s20  }
  0x15   :  { %s5971_s23 = smov [#allocation11]   ;;  %s5972_s25 = smov [#allocation14]  }
  0x16   :  { %s64_s24 = sshll.u32 %s5971_s23, 4  ;;  %s88_s26 = sshll.u32 %s5972_s25, 4  ;;  %s65_s24 = int_to_ptr.vmem [resolvable:$true] %s64_s24  ;;  %s89_s26 = int_to_ptr.vmem [resolvable:$true] %s88_s26 }
  0x17   :  { %s5804_s29 = scalar_lea.hbm %s6611_s5, 1024 }
  0x18   :  { %p5805_p8 = scmp.ne.s32.totalorder %s6611_s5, %s5804_s29  ;;  %p5808_p9 = scmp.lt.u32.totalorder %s5804_s29, %s6611_s5 }
  0x1a   :  { %p5810_p10 = pnand %p5808_p9, %p5805_p8 }
  0x1c   :  { %5813 = shalt.err (!%p5810_p10)
}
  0x1d   :  { %s5814_s1 = scalar_lea.vmem %s65_s24, 1024  ;;  %p5819_p12 = scmp.lt.s32.totalorder %s65_s24, %s65_s24 }
  0x1e   :  { %p5815_p11 = scmp.ne.s32.totalorder %s65_s24, %s5814_s1  ;;  %p5820_p13 = scmp.lt.s32.totalorder %s5814_s1, %s5814_s1 }
  0x20   :  { %p5821_p0 = por %p5820_p13, %p5819_p12 }
  0x22   :  { %p5822_p1 = pnand %p5821_p0, %p5815_p11 }
  0x24   :  { %5825 = shalt.err (!%p5822_p1)
}
  0x25   :  { %s5973_s10 = smov 64   ;;  %s5974_s14 = smov 4  }
  0x26   :  { %70 = dma.hbm_to_vmem [thread:$0]  %s6611_s5, 1024, %s65_s24, [#allocation12], %s5973_s10, %s5973_s10, %s5974_s14  }
  0x27   :  { %s5826_s21 = scalar_lea.hbm %s6613_s7, 4096 }
  0x28   :  { %p5827_p2 = scmp.ne.s32.totalorder %s6613_s7, %s5826_s21  ;;  %p5830_p3 = scmp.lt.u32.totalorder %s5826_s21, %s6613_s7 }
  0x2a   :  { %p5832_p4 = pnand %p5830_p3, %p5827_p2 }
  0x2c   :  { %5835 = shalt.err (!%p5832_p4)
}
  0x2d   :  { %s5836_s28 = scalar_lea.vmem %s89_s26, 4096  ;;  %p5841_p6 = scmp.lt.s32.totalorder %s89_s26, %s89_s26 }
  0x2e   :  { %p5837_p5 = scmp.ne.s32.totalorder %s89_s26, %s5836_s28  ;;  %p5842_p7 = scmp.lt.s32.totalorder %s5836_s28, %s5836_s28 }
  0x30   :  { %p5843_p8 = por %p5842_p7, %p5841_p6 }
  0x32   :  { %p5844_p9 = pnand %p5843_p8, %p5837_p5 }
  0x34   :  { %5847 = shalt.err (!%p5844_p9)
}
  0x35   :  { %94 = dma.hbm_to_vmem [thread:$0]  %s6613_s7, 4096, %s89_s26, [#allocation15], %s5973_s10, %s5973_s10, %s5974_s14  }
  0x36   :  { %s5975_s29 = smov [#allocation5]   ;;  %s5976_s11 = smov [#allocation10]  }
  0x37   :  { %s24_s30 = sshll.u32 %s5975_s29, 4  ;;  %s50_s12 = sshll.u32 %s5976_s11, 4  ;;  %s25_s30 = int_to_ptr.vmem [resolvable:$true] %s24_s30  ;;  %s51_s12 = int_to_ptr.vmem [resolvable:$true] %s50_s12 }
  0x38   :  { %s5848_s15 = scalar_lea.hbm %s6606_s0, 512 }
  0x39   :  { %p5849_p10 = scmp.ne.s32.totalorder %s6606_s0, %s5848_s15  ;;  %p5852_p11 = scmp.lt.u32.totalorder %s5848_s15, %s6606_s0 }
  0x3b   :  { %p5854_p12 = pnand %p5852_p11, %p5849_p10 }
  0x3d   :  { %5857 = shalt.err (!%p5854_p12)
}
  0x3e   :  { %s5858_s7 = scalar_lea.vmem %s25_s30, 512  ;;  %p5863_p0 = scmp.lt.s32.totalorder %s25_s30, %s25_s30 }
  0x3f   :  { %p5859_p13 = scmp.ne.s32.totalorder %s25_s30, %s5858_s7  ;;  %p5864_p1 = scmp.lt.s32.totalorder %s5858_s7, %s5858_s7 }
  0x41   :  { %p5865_p2 = por %p5864_p1, %p5863_p0 }
  0x43   :  { %p5866_p3 = pnand %p5865_p2, %p5859_p13 }
  0x45   :  { %5869 = shalt.err (!%p5866_p3)
}
  0x46   :  { %30 = dma.hbm_to_vmem [thread:$0]  %s6606_s0, 512, %s25_s30, [#allocation6], %s5973_s10, %s5973_s10, %s5974_s14  }
  0x47   :  { %s5870_s27 = scalar_lea.hbm %s6609_s3, 4096 }
  0x48   :  { %p5871_p4 = scmp.ne.s32.totalorder %s6609_s3, %s5870_s27  ;;  %p5874_p5 = scmp.lt.u32.totalorder %s5870_s27, %s6609_s3 }
  0x4a   :  { %p5876_p6 = pnand %p5874_p5, %p5871_p4 }
  0x4c   :  { %5879 = shalt.err (!%p5876_p6)
}
  0x4d   :  { %s5880_s11 = scalar_lea.vmem %s51_s12, 4096  ;;  %p5885_p8 = scmp.lt.s32.totalorder %s51_s12, %s51_s12 }
  0x4e   :  { %p5881_p7 = scmp.ne.s32.totalorder %s51_s12, %s5880_s11  ;;  %p5886_p9 = scmp.lt.s32.totalorder %s5880_s11, %s5880_s11 }
  0x50   :  { %p5887_p10 = por %p5886_p9, %p5885_p8 }
  0x52   :  { %p5888_p11 = pnand %p5887_p10, %p5881_p7 }
  0x54   :  { %5891 = shalt.err (!%p5888_p11)
}
  0x55   :  { %56 = dma.hbm_to_vmem [thread:$0]  %s6609_s3, 4096, %s51_s12, [#allocation9], %s5973_s10, %s5973_s10, %s5974_s14  }
  0x56   :  { %s5977_s13 = smov [#allocation13]   ;;  %s5978_s15 = smov [#allocation16]  }
  0x57   :  { %s76_s1 = sshll.u32 %s5977_s13, 4  ;;  %s100_s16 = sshll.u32 %s5978_s15, 4  ;;  %s77_s1 = int_to_ptr.vmem [resolvable:$true] %s76_s1  ;;  %s101_s16 = int_to_ptr.vmem [resolvable:$true] %s100_s16 }
  0x58   :  { %s5892_s21 = scalar_lea.hbm %s6612_s6, 4096 }
  0x59   :  { %p5893_p12 = scmp.ne.s32.totalorder %s6612_s6, %s5892_s21  ;;  %p5896_p13 = scmp.lt.u32.totalorder %s5892_s21, %s6612_s6 }
  0x5b   :  { %p5898_p0 = pnand %p5896_p13, %p5893_p12 }
  0x5d   :  { %5901 = shalt.err (!%p5898_p0)
}
  0x5e   :  { %s5902_s3 = scalar_lea.vmem %s77_s1, 4096  ;;  %p5907_p2 = scmp.lt.s32.totalorder %s77_s1, %s77_s1 }
  0x5f   :  { %p5903_p1 = scmp.ne.s32.totalorder %s77_s1, %s5902_s3  ;;  %p5908_p3 = scmp.lt.s32.totalorder %s5902_s3, %s5902_s3 }
  0x61   :  { %p5909_p4 = por %p5908_p3, %p5907_p2 }
  0x63   :  { %p5910_p5 = pnand %p5909_p4, %p5903_p1 }
  0x65   :  { %5913 = shalt.err (!%p5910_p5)
}
  0x66   :  { %82 = dma.hbm_to_vmem [thread:$0]  %s6612_s6, 4096, %s77_s1, [#allocation12], %s5969_s19, %s5969_s19, %s5970_s20  }
  0x67   :  { %s5914_s5 = scalar_lea.hbm %s6614_s8, 1024 }
  0x68   :  { %p5915_p6 = scmp.ne.s32.totalorder %s6614_s8, %s5914_s5  ;;  %p5918_p7 = scmp.lt.u32.totalorder %s5914_s5, %s6614_s8 }
  0x6a   :  { %p5920_p8 = pnand %p5918_p7, %p5915_p6 }
  0x6c   :  { %5923 = shalt.err (!%p5920_p8)
}
  0x6d   :  { %s5924_s30 = scalar_lea.vmem %s101_s16, 1024  ;;  %p5929_p10 = scmp.lt.s32.totalorder %s101_s16, %s101_s16 }
  0x6e   :  { %p5925_p9 = scmp.ne.s32.totalorder %s101_s16, %s5924_s30  ;;  %p5930_p11 = scmp.lt.s32.totalorder %s5924_s30, %s5924_s30 }
  0x70   :  { %p5931_p12 = por %p5930_p11, %p5929_p10 }
  0x72   :  { %p5932_p13 = pnand %p5931_p12, %p5925_p9 }
  0x74   :  { %5935 = shalt.err (!%p5932_p13)
}
  0x75   :  { %106 = dma.hbm_to_vmem [thread:$0]  %s6614_s8, 1024, %s101_s16, [#allocation15], %s5973_s10, %s5973_s10, %s5974_s14  }
  0x76   :  { %5958 = dma.done.wait [#allocation6], 512  }
  0x77   :  { %5959 = vsyncadd [#allocation6], 4294966784 }
  0x78   :  { %5960 = dma.done.wait [#allocation9], 8192  }
  0x79   :  { %5961 = vsyncadd [#allocation9], 4294959104 }
  0x7a   :  { %5962 = dma.done.wait [#allocation12], 5120  }
  0x7b   :  { %5963 = vsyncadd [#allocation12], 4294962176 }
  0x7c   :  { %5964 = dma.done.wait [#allocation15], 5120  }
  0x7d   :  { %5965 = vsyncadd [#allocation15], 4294962176  ;;  %v5979_v0 = vmov 0   ;;  %v5474_v1 = vld [vmem:[#allocation11] sm:$0xff]   ;;  %v5475_v2 = vld [vmem:[#allocation11 + $0x8] sm:$0xff]  }
  0x7e   :  { %641 = vmatprep.mubr.bf16.mxu1 %v5979_v0  ;;  %5411 = vmatprep.subr.bf16.mxu0 %v5474_v1  ;;  %v5476_v3 = vld [vmem:[#allocation11 + $0x10] sm:$0xff]   ;;  %v5477_v4 = vld [vmem:[#allocation11 + $0x18] sm:$0xff]   ;;  %v6139_v5 = vld [vmem:[#allocation5] sm:$0xff]  }
  0x7f   :  { %5412 = vmatpush3.bf16.msra.mxu0 %v5474_v1  ;;  %5427 = vmatprep.mubr.bf16.mxu0 %v6139_v5  ;;  %v5478_v6 = vld [vmem:[#allocation11 + $0x20] sm:$0xff]   ;;  %v5479_v10 = vld [vmem:[#allocation11 + $0x28] sm:$0xff]   ;;  %v5480_v13 = vld [vmem:[#allocation11 + $0x30] sm:$0xff]  }
  0x80   :  { %5413 = vmatprep.subr.bf16.mxu0 %v5475_v2  ;;  %v5486_v7 = vld [vmem:[#allocation8 + $0x4] ss:$16 sps:$4 sm:$0xff]   ;;  %v5491_v8 = vld [vmem:[#allocation8] ss:$16 sps:$4 sm:$0xff]   ;;  %v5481_v16 = vld [vmem:[#allocation11 + $0x38] sm:$0xff]  }
  0x81   :  { %609 = vmatprep.subr.bf16.mxu1 %v5486_v7  ;;  %v5492_v9 = vld [vmem:[#allocation8 + $0x24] ss:$16 sps:$4 sm:$0xff]   ;;  %v5497_v11 = vld [vmem:[#allocation8 + $0x20] ss:$16 sps:$4 sm:$0xff]   ;;  %v5490_v19 = vld [vmem:[#allocation8 + $0xc] ss:$16 sps:$4 sm:$0xff]  }
  0x82   :  { %610 = vmatpush1.bf16.msra.mxu1 %v5491_v8  ;;  %v5498_v12 = vld [vmem:[#allocation8 + $0x44] ss:$16 sps:$4 sm:$0xff]   ;;  %v5503_v14 = vld [vmem:[#allocation8 + $0x40] ss:$16 sps:$4 sm:$0xff]   ;;  %v6142_v22 = vld [vmem:[#allocation5 + $0x8] sm:$0xff]  }
  0x83   :  { %5414 = vmatpush3.bf16.msra.mxu0 %v5475_v2  ;;  %611 = vmatprep.subr.bf16.mxu1 %v5492_v9  ;;  %v5504_v15 = vld [vmem:[#allocation8 + $0x64] ss:$16 sps:$4 sm:$0xff]   ;;  %v5509_v17 = vld [vmem:[#allocation8 + $0x60] ss:$16 sps:$4 sm:$0xff]   ;;  %v5488_v24 = vld [vmem:[#allocation8 + $0x8] ss:$16 sps:$4 sm:$0xff]  }
  0x84   :  { %5415 = vmatprep.subr.bf16.mxu0 %v5476_v3  ;;  %v5510_v18 = vld [vmem:[#allocation8 + $0x84] ss:$16 sps:$4 sm:$0xff]   ;;  %v5515_v20 = vld [vmem:[#allocation8 + $0x80] ss:$16 sps:$4 sm:$0xff]   ;;  %v5496_v25 = vld [vmem:[#allocation8 + $0x2c] ss:$16 sps:$4 sm:$0xff]  }
  0x85   :  { %v5516_v21 = vld [vmem:[#allocation8 + $0xa4] ss:$16 sps:$4 sm:$0xff]   ;;  %v5521_v26 = vld [vmem:[#allocation8 + $0xa0] ss:$16 sps:$4 sm:$0xff]   ;;  %v5494_v28 = vld [vmem:[#allocation8 + $0x28] ss:$16 sps:$4 sm:$0xff]  }
  0x86   :  { %612 = vmatpush1.bf16.msra.mxu1 %v5497_v11  ;;  %v6144_v23 = vld [vmem:[#allocation5 + $0x10] sm:$0xff]   ;;  %v5502_v29 = vld [vmem:[#allocation8 + $0x4c] ss:$16 sps:$4 sm:$0xff]   ;;  %v5500_v33 = vld [vmem:[#allocation8 + $0x48] ss:$16 sps:$4 sm:$0xff]  }
  0x87   :  { %5416 = vmatpush3.bf16.msra.mxu0 %v5476_v3  ;;  %613 = vmatprep.subr.bf16.mxu1 %v5498_v12  ;;  %v5522_v27 = vld [vmem:[#allocation8 + $0xc4] ss:$16 sps:$4 sm:$0xff]   ;;  %v5527_v30 = vld [vmem:[#allocation8 + $0xc0] ss:$16 sps:$4 sm:$0xff]   ;;  %v6148_v32 = vld [vmem:[#allocation5 + $0x18] sm:$0xff]  }
  0x88   :  { %5417 = vmatprep.subr.bf16.mxu0 %v5477_v4  ;;  %v5528_v31 = vld [vmem:[#allocation8 + $0xe4] ss:$16 sps:$4 sm:$0xff]   ;;  %v5508_v34 = vld [vmem:[#allocation8 + $0x6c] ss:$16 sps:$4 sm:$0xff]   ;;  %v5533_v35 = vld [vmem:[#allocation8 + $0xe0] ss:$16 sps:$4 sm:$0xff]  }
  0x89   :  { %v5536_v36 = vld [vmem:[#allocation13 + $0x4] ss:$16 sps:$4 sm:$0xff]   ;;  %v5506_v37 = vld [vmem:[#allocation8 + $0x68] ss:$16 sps:$4 sm:$0xff]   ;;  %v5514_v38 = vld [vmem:[#allocation8 + $0x8c] ss:$16 sps:$4 sm:$0xff]  }
  0x8a   :  { %614 = vmatpush1.bf16.msra.mxu1 %v5503_v14  ;;  %v5534_v39 = vld [vmem:[#allocation13] ss:$16 sps:$4 sm:$0xff]   ;;  %v5542_v40 = vld [vmem:[#allocation13 + $0x24] ss:$16 sps:$4 sm:$0xff]   ;;  %v5512_v41 = vld [vmem:[#allocation8 + $0x88] ss:$16 sps:$4 sm:$0xff]  }
  0x8b   :  { %5418 = vmatpush3.bf16.msra.mxu0 %v5477_v4  ;;  %615 = vmatprep.subr.bf16.mxu1 %v5504_v15  ;;  %v5520_v42 = vld [vmem:[#allocation8 + $0xac] ss:$16 sps:$4 sm:$0xff]   ;;  %v5540_v43 = vld [vmem:[#allocation13 + $0x20] ss:$16 sps:$4 sm:$0xff]   ;;  %v5548_v44 = vld [vmem:[#allocation13 + $0x44] ss:$16 sps:$4 sm:$0xff]  }
  0x8c   :  { %5419 = vmatprep.subr.bf16.mxu0 %v5478_v6  ;;  %v5518_v45 = vld [vmem:[#allocation8 + $0xa8] ss:$16 sps:$4 sm:$0xff]   ;;  %v5526_v46 = vld [vmem:[#allocation8 + $0xcc] ss:$16 sps:$4 sm:$0xff]   ;;  %v5546_v47 = vld [vmem:[#allocation13 + $0x40] ss:$16 sps:$4 sm:$0xff]  }
  0x8d   :  { %v5554_v48 = vld [vmem:[#allocation13 + $0x64] ss:$16 sps:$4 sm:$0xff]   ;;  %v5524_v49 = vld [vmem:[#allocation8 + $0xc8] ss:$16 sps:$4 sm:$0xff]   ;;  %v5532_v50 = vld [vmem:[#allocation8 + $0xec] ss:$16 sps:$4 sm:$0xff]  }
  0x8e   :  { %616 = vmatpush1.bf16.msra.mxu1 %v5509_v17  ;;  %v5552_v51 = vld [vmem:[#allocation13 + $0x60] ss:$16 sps:$4 sm:$0xff]   ;;  %v5560_v52 = vld [vmem:[#allocation13 + $0x84] ss:$16 sps:$4 sm:$0xff]   ;;  %v5530_v53 = vld [vmem:[#allocation8 + $0xe8] ss:$16 sps:$4 sm:$0xff]  }
  0x8f   :  { %5420 = vmatpush3.bf16.msra.mxu0 %v5478_v6  ;;  %617 = vmatprep.subr.bf16.mxu1 %v5510_v18  ;;  %v5539_v54 = vld [vmem:[#allocation13 + $0xc] ss:$16 sps:$4 sm:$0xff]   ;;  %v5558_v55 = vld [vmem:[#allocation13 + $0x80] ss:$16 sps:$4 sm:$0xff]   ;;  %v5566_v56 = vld [vmem:[#allocation13 + $0xa4] ss:$16 sps:$4 sm:$0xff]  }
  0x90   :  { %5421 = vmatprep.subr.bf16.mxu0 %v5479_v10  ;;  %v5537_v57 = vld [vmem:[#allocation13 + $0x8] ss:$16 sps:$4 sm:$0xff]   ;;  %v5545_v58 = vld [vmem:[#allocation13 + $0x2c] ss:$16 sps:$4 sm:$0xff]   ;;  %v5564_v59 = vld [vmem:[#allocation13 + $0xa0] ss:$16 sps:$4 sm:$0xff]  }
  0x91   :  { %v5572_v60 = vld [vmem:[#allocation13 + $0xc4] ss:$16 sps:$4 sm:$0xff]   ;;  %v5543_v61 = vld [vmem:[#allocation13 + $0x28] ss:$16 sps:$4 sm:$0xff]   ;;  %v5551_v62 = vld [vmem:[#allocation13 + $0x4c] ss:$16 sps:$4 sm:$0xff]  }
  0x92   :  { %618 = vmatpush1.bf16.msra.mxu1 %v5515_v20  ;;  %v5570_v63 = vld [vmem:[#allocation13 + $0xc0] ss:$16 sps:$4 sm:$0xff]   ;;  %v5549_v1 = vld [vmem:[#allocation13 + $0x48] ss:$16 sps:$4 sm:$0xff]   ;;  %v5557_v2 = vld [vmem:[#allocation13 + $0x6c] ss:$16 sps:$4 sm:$0xff]  }
  0x93   :  { %5422 = vmatpush3.bf16.msra.mxu0 %v5479_v10  ;;  %619 = vmatprep.subr.bf16.mxu1 %v5516_v21  ;;  %v5555_v3 = vld [vmem:[#allocation13 + $0x68] ss:$16 sps:$4 sm:$0xff]   ;;  %v5563_v4 = vld [vmem:[#allocation13 + $0x8c] ss:$16 sps:$4 sm:$0xff]   ;;  %v5578_v10 = vld [vmem:[#allocation13 + $0xe4] ss:$16 sps:$4 sm:$0xff]  }
  0x94   :  { %5423 = vmatprep.subr.bf16.mxu0 %v5480_v13  ;;  %v5569_v6 = vld [vmem:[#allocation13 + $0xac] ss:$16 sps:$4 sm:$0xff]   ;;  %v5567_v7 = vld [vmem:[#allocation13 + $0xa8] ss:$16 sps:$4 sm:$0xff]   ;;  %v5576_v12 = vld [vmem:[#allocation13 + $0xe0] ss:$16 sps:$4 sm:$0xff]  }
  0x95   :  { %v5575_v8 = vld [vmem:[#allocation13 + $0xcc] ss:$16 sps:$4 sm:$0xff]   ;;  %v5573_v9 = vld [vmem:[#allocation13 + $0xc8] ss:$16 sps:$4 sm:$0xff]  }
  0x96   :  { %620 = vmatpush1.bf16.msra.mxu1 %v5521_v26  ;;  %v5581_v11 = vld [vmem:[#allocation13 + $0xec] ss:$16 sps:$4 sm:$0xff]  }
  0x97   :  { %5424 = vmatpush3.bf16.msra.mxu0 %v5480_v13  ;;  %621 = vmatprep.subr.bf16.mxu1 %v5522_v27  ;;  %v5579_v13 = vld [vmem:[#allocation13 + $0xe8] ss:$16 sps:$4 sm:$0xff]  }
  0x98   :  { %5425 = vmatprep.subr.bf16.mxu0 %v5481_v16 }
  0x9a   :  { %622 = vmatpush1.bf16.msra.mxu1 %v5527_v30 }
  0x9b   :  { %5426 = vmatpush3.bf16.msra.mxu0 %v5481_v16  ;;  %623 = vmatprep.subr.bf16.mxu1 %v5528_v31 }
  0x9c   :  { %682 = vmatprep.subr.bf16.mxu0 %v5490_v19 }
  0x9e   :  { %5428 = vmatmul.mubr.bf16.vlgmr.msra.gmra.mrb[0].mxu0 %v6142_v22  ;;  %624 = vmatpush1.bf16.msra.mxu1 %v5533_v35 }
  0x9f   :  { %5431 = vmatprep.mubr.bf16.mxu0 %v6144_v23  ;;  %683 = vmatpush1.bf16.msra.mxu0 %v5488_v24 }
  0xa0   :  { %684 = vmatprep.subr.bf16.mxu0 %v5496_v25  ;;  %2422 = vmatprep.subr.bf16.mxu1 %v5536_v36 }
  0xa1   :  { %642 = vmatmul.mubr.bf16.vlgmr.msra.gmra.mrb[0].mxu1 %v6139_v5 }
  0xa2   :  { %2423 = vmatpush1.bf16.msra.mxu1 %v5534_v39  ;;  %651 = vmatprep.mubr.bf16.mxu1 %v5979_v0 }
  0xa3   :  { %685 = vmatpush1.bf16.msra.mxu0 %v5494_v28  ;;  %2424 = vmatprep.subr.bf16.mxu1 %v5542_v40 }
  0xa4   :  { %686 = vmatprep.subr.bf16.mxu0 %v5502_v29 }
  0xa6   :  { %5432 = vmatmul.mubr.bf16.gmra.mrb[4].mxu0 %v6148_v32  ;;  %2425 = vmatpush1.bf16.msra.mxu1 %v5540_v43 }
  0xa7   :  { %687 = vmatpush1.bf16.msra.mxu0 %v5500_v33  ;;  %714 = vmatprep.mubr.bf16.mxu0 %v5979_v0 }
  0xa8   :  { %688 = vmatprep.subr.bf16.mxu0 %v5508_v34  ;;  %2426 = vmatprep.subr.bf16.mxu1 %v5548_v44 }
  0xa9   :  { %652 = vmatmul.mubr.bf16.gmra.mrb[4].mxu1 %v6142_v22 }
  0xaa   :  { %2427 = vmatpush1.bf16.msra.mxu1 %v5546_v47  ;;  %661 = vmatprep.mubr.bf16.mxu1 %v5979_v0 }
  0xab   :  { %689 = vmatpush1.bf16.msra.mxu0 %v5506_v37  ;;  %2428 = vmatprep.subr.bf16.mxu1 %v5554_v48 }
  0xac   :  { %690 = vmatprep.subr.bf16.mxu0 %v5514_v38 }
  0xae   :  { %2429 = vmatpush1.bf16.msra.mxu1 %v5552_v51 }
  0xaf   :  { %691 = vmatpush1.bf16.msra.mxu0 %v5512_v41  ;;  %2430 = vmatprep.subr.bf16.mxu1 %v5560_v52 }
  0xb0   :  { %692 = vmatprep.subr.bf16.mxu0 %v5520_v42 }
  0xb1   :  { %662 = vmatmul.mubr.bf16.gmra.mrb[8].mxu1 %v6144_v23 }
  0xb2   :  { %2431 = vmatpush1.bf16.msra.mxu1 %v5558_v55  ;;  %671 = vmatprep.mubr.bf16.mxu1 %v5979_v0 }
  0xb3   :  { %693 = vmatpush1.bf16.msra.mxu0 %v5518_v45  ;;  %2432 = vmatprep.subr.bf16.mxu1 %v5566_v56 }
  0xb4   :  { %694 = vmatprep.subr.bf16.mxu0 %v5526_v46 }
  0xb6   :  { %2433 = vmatpush1.bf16.msra.mxu1 %v5564_v59  ;;  %v5584_v59 = vld [vmem:[#allocation10] sm:$0xff]  }
  0xb7   :  { %695 = vmatpush1.bf16.msra.mxu0 %v5524_v49  ;;  %2434 = vmatprep.subr.bf16.mxu1 %v5572_v60  ;;  %v5585_v60 = vld [vmem:[#allocation10 + $0x80] sm:$0xff]  }
  0xb8   :  { %696 = vmatprep.subr.bf16.mxu0 %v5532_v50 }
  0xb9   :  { %672 = vmatmul.mubr.bf16.gmra.mrb[12].mxu1 %v6148_v32 }
  0xba   :  { %2435 = vmatpush1.bf16.msra.mxu1 %v5570_v63  ;;  %2454 = vmatprep.mubr.bf16.mxu1 %v5979_v0  ;;  %v5588_v63 = vld [vmem:[#allocation10 + $0x8] sm:$0xff]  }
  0xbb   :  { %697 = vmatpush1.bf16.msra.mxu0 %v5530_v53  ;;  %2436 = vmatprep.subr.bf16.mxu1 %v5578_v10  ;;  %v5598_v10 = vld [vmem:[#allocation10 + $0x60] sm:$0xff]  }
  0xbc   :  { %2495 = vmatprep.subr.bf16.mxu0 %v5539_v54 }
  0xbe   :  { %715 = vmatmul.mubr.bf16.vlgmr.msra.gmra.mrb[8].mxu0 %v6139_v5  ;;  %v5561_v5 = vld [vmem:[#allocation13 + $0x88] ss:$16 sps:$4 sm:$0xff]   ;;  %2437 = vmatpush1.bf16.msra.mxu1 %v5576_v12  ;;  %v5600_v12 = vld [vmem:[#allocation10 + $0x20] sm:$0xff]  }
  0xbf   :  { %2496 = vmatpush1.bf16.msra.mxu0 %v5537_v57  ;;  %724 = vmatprep.mubr.bf16.mxu0 %v5979_v0  ;;  %v5582_v57 = vld [vmem:[#allocation10 + $0x40] sm:$0xff]  }
  0xc0   :  { %2497 = vmatprep.subr.bf16.mxu0 %v5545_v58  ;;  %v5583_v58 = vld [vmem:[#allocation10 + $0xc0] sm:$0xff]   ;;  %5239 = vmatprep.subr.bf16.mxu1 %v5582_v57 }
  0xc1   :  { %v5614_v57 = vld [vmem:[#allocation14 + $0x40] sm:$0xff]  }
  0xc3   :  { %2498 = vmatpush1.bf16.msra.mxu0 %v5543_v61  ;;  %v5586_v61 = vld [vmem:[#allocation10 + $0x48] sm:$0xff]  }
  0xc4   :  { %2499 = vmatprep.subr.bf16.mxu0 %v5551_v62  ;;  %v5587_v62 = vld [vmem:[#allocation10 + $0xc8] sm:$0xff]  }
  0xc6   :  { %725 = vmatmul.mubr.bf16.gmra.mrb[12].mxu0 %v6142_v22 }
  0xc7   :  { %2500 = vmatpush1.bf16.msra.mxu0 %v5549_v1  ;;  %734 = vmatprep.mubr.bf16.mxu0 %v5979_v0  ;;  %v5589_v1 = vld [vmem:[#allocation10 + $0x88] sm:$0xff]  }
  0xc8   :  { %2501 = vmatprep.subr.bf16.mxu0 %v5557_v2  ;;  %v5590_v2 = vld [vmem:[#allocation10 + $0x50] sm:$0xff]  }
  0xcb   :  { %2502 = vmatpush1.bf16.msra.mxu0 %v5555_v3  ;;  %v5591_v3 = vld [vmem:[#allocation10 + $0xd0] sm:$0xff]  }
  0xcc   :  { %2503 = vmatprep.subr.bf16.mxu0 %v5563_v4  ;;  %v5592_v4 = vld [vmem:[#allocation10 + $0x10] sm:$0xff]  }
  0xce   :  { %735 = vmatmul.mubr.bf16.gmra.mrb[16].mxu0 %v6144_v23 }
  0xcf   :  { %2504 = vmatpush1.bf16.msra.mxu0 %v5561_v5  ;;  %744 = vmatprep.mubr.bf16.mxu0 %v5979_v0  ;;  %v5593_v5 = vld [vmem:[#allocation10 + $0x90] sm:$0xff]  }
  0xd0   :  { %2505 = vmatprep.subr.bf16.mxu0 %v5569_v6  ;;  %v5594_v6 = vld [vmem:[#allocation10 + $0x58] sm:$0xff]  }
  0xd3   :  { %2506 = vmatpush1.bf16.msra.mxu0 %v5567_v7  ;;  %v5595_v7 = vld [vmem:[#allocation10 + $0xd8] sm:$0xff]  }
  0xd4   :  { %2507 = vmatprep.subr.bf16.mxu0 %v5575_v8  ;;  %v5596_v8 = vld [vmem:[#allocation10 + $0x18] sm:$0xff]  }
  0xd6   :  { %745 = vmatmul.mubr.bf16.gmra.mrb[20].mxu0 %v6148_v32 }
  0xd7   :  { %2508 = vmatpush1.bf16.msra.mxu0 %v5573_v9  ;;  %2527 = vmatprep.mubr.bf16.mxu0 %v5979_v0  ;;  %v5597_v9 = vld [vmem:[#allocation10 + $0x98] sm:$0xff]  }
  0xd8   :  { %2509 = vmatprep.subr.bf16.mxu0 %v5581_v11  ;;  %v5599_v11 = vld [vmem:[#allocation10 + $0xe0] sm:$0xff]  }
  0xdb   :  { %2510 = vmatpush1.bf16.msra.mxu0 %v5579_v13  ;;  %v5601_v13 = vld [vmem:[#allocation10 + $0xa0] sm:$0xff]  }
  0xdc   :  { %5279 = vmatprep.subr.bf16.mxu0 %v5583_v58  ;;  %v5615_v58 = vld [vmem:[#allocation14 + $0xc0] sm:$0xff]  }
 0x171   :  { %v5429_v14 = vpop.f32.mrb[0].mxu0 }
 0x172   :  { %v332_v15 = vpop.f32.mrb[1].mxu0 }
 0x173   :  { %v5430_v16 = vpop.f32.mrb[2].mxu0 }
 0x174   :  { %v364_v17 = vpack.c.bf16 %v5430_v16, %v5429_v14  ;;  %v335_v18 = vpop.f32.mrb[3].mxu0  ;;  %v6170_v26 = vpop.f32.mrb[0].mxu1  ;;  %v5602_v14 = vld [vmem:[#allocation10 + $0x68] sm:$0xff]  }
 0x175   :  { %v363_v19 = vpack.c.bf16 %v335_v18, %v332_v15  ;;  %v6172_v27 = vpop.f32.mrb[1].mxu1  ;;  %v5603_v15 = vld [vmem:[#allocation10 + $0xe8] sm:$0xff]   ;;  %v5606_v18 = vld [vmem:[#allocation10 + $0x70] sm:$0xff]  }
 0x176   :  { %v6176_v28 = vpop.f32.mrb[2].mxu1  ;;  %v5604_v16 = vld [vmem:[#allocation10 + $0x28] sm:$0xff]  }
 0x177   :  { %2455 = vmatmul.mubr.bf16.vlgmr.msra.gmra.mrb[16].mxu1 %v363_v19  ;;  %2528 = vmatmul.mubr.bf16.vlgmr.msra.gmra.mrb[24].mxu0 %v363_v19  ;;  %v6178_v29 = vpop.f32.mrb[3].mxu1  ;;  %v5607_v19 = vld [vmem:[#allocation10 + $0xf0] sm:$0xff]  }
 0x178   :  { %2464 = vmatprep.mubr.bf16.mxu1 %v5979_v0  ;;  %2537 = vmatprep.mubr.bf16.mxu0 %v5979_v0 }
 0x179   :  { %v5433_v20 = vpop.f32.mrb[4].mxu0  ;;  %5240 = vmatpush3.bf16.msra.mxu1 %v5584_v59  ;;  %5280 = vmatpush3.bf16.msra.mxu0 %v5585_v60  ;;  %v405_v59 = vlaneseq }
 0x17a   :  { %v348_v21 = vpop.f32.mrb[5].mxu0  ;;  %5241 = vmatprep.subr.bf16.mxu1 %v5586_v61  ;;  %5281 = vmatprep.subr.bf16.mxu0 %v5587_v62 }
 0x17b   :  { %v5434_v22 = vpop.f32.mrb[6].mxu0  ;;  %v406_v60 = vshrl.u32 %v405_v59, 7 }
 0x17c   :  { %v366_v23 = vpack.c.bf16 %v5434_v22, %v5433_v20  ;;  %v351_v24 = vpop.f32.mrb[7].mxu0  ;;  %v6180_v30 = vpop.f32.mrb[4].mxu1  ;;  %v5608_v20 = vld [vmem:[#allocation10 + $0x30] sm:$0xff]   ;;  %v5610_v22 = vld [vmem:[#allocation10 + $0x78] sm:$0xff]  }
 0x17d   :  { %v365_v25 = vpack.c.bf16 %v351_v24, %v348_v21  ;;  %v6182_v31 = vpop.f32.mrb[5].mxu1  ;;  %5242 = vmatpush3.bf16.msra.mxu1 %v5588_v63  ;;  %5282 = vmatpush3.bf16.msra.mxu0 %v5589_v1  ;;  %v5609_v21 = vld [vmem:[#allocation10 + $0xb0] sm:$0xff]   ;;  %v5612_v24 = vld [vmem:[#allocation10 + $0x38] sm:$0xff]   ;;  %v407_v61 = vsub.s32 0, %v406_v60  ;;  %v411_v62 = vsub.s32 1, %v406_v60  ;;  %v415_v1 = vsub.s32 2, %v406_v60 }
 0x17e   :  { %v6186_v32 = vpop.f32.mrb[6].mxu1  ;;  %5243 = vmatprep.subr.bf16.mxu1 %v5590_v2  ;;  %5283 = vmatprep.subr.bf16.mxu0 %v5591_v3  ;;  %v403_v63 = vld [vmem:[%s6608_s2] sm:$0xf]  ;;  %v419_v2 = vsub.s32 3, %v406_v60 }
 0x17f   :  { %2465 = vmatmul.mubr.bf16.gmra.mrb[20].mxu1 %v364_v17  ;;  %2538 = vmatmul.mubr.bf16.gmra.mrb[28].mxu0 %v364_v17  ;;  %v6188_v33 = vpop.f32.mrb[7].mxu1  ;;  %v5605_v17 = vld [vmem:[#allocation10 + $0xa8] sm:$0xff]   ;;  %v6241_v3 = vrot.slane %v403_v63, %v407_v61 }
 0x180   :  { %2474 = vmatprep.mubr.bf16.mxu1 %v5979_v0  ;;  %2547 = vmatprep.mubr.bf16.mxu0 %v5979_v0 }
 0x181   :  { %5244 = vmatpush3.bf16.msra.mxu1 %v5592_v4  ;;  %5284 = vmatpush3.bf16.msra.mxu0 %v5593_v5  ;;  %v6243_v4 = vrot.slane %v403_v63, %v411_v62  ;;  %v6245_v5 = vrot.slane %v403_v63, %v415_v1 }
 0x182   :  { %5245 = vmatprep.subr.bf16.mxu1 %v5594_v6  ;;  %5285 = vmatprep.subr.bf16.mxu0 %v5595_v7  ;;  %v6247_v6 = vrot.slane %v403_v63, %v419_v2  ;;  %v644_v7 = vadd.f32 %v6170_v26, %v6241_v3  ;;  %v6267_v26 = vadd.f32 %v6186_v32, %v6241_v3 }
 0x184   :  { %v6190_v34 = vpop.f32.mrb[8].mxu1 }
 0x185   :  { %v6192_v35 = vpop.f32.mrb[9].mxu1  ;;  %5246 = vmatpush3.bf16.msra.mxu1 %v5596_v8  ;;  %5286 = vmatpush3.bf16.msra.mxu0 %v5597_v9  ;;  %v646_v8 = vadd.f32 %v6172_v27, %v6243_v4  ;;  %v648_v9 = vadd.f32 %v6176_v28, %v6241_v3  ;;  %v6271_v27 = vadd.f32 %v6188_v33, %v6243_v4 }
 0x186   :  { %v6194_v36 = vpop.f32.mrb[10].mxu1  ;;  %5247 = vmatprep.subr.bf16.mxu1 %v5598_v10  ;;  %5287 = vmatprep.subr.bf16.mxu0 %v5599_v11  ;;  %v650_v10 = vadd.f32 %v6178_v29, %v6243_v4  ;;  %v6259_v11 = vadd.f32 %v6180_v30, %v6241_v3  ;;  %v6275_v28 = vadd.f32 %v6190_v34, %v6241_v3 }
 0x187   :  { %2475 = vmatmul.mubr.bf16.gmra.mrb[24].mxu1 %v365_v25  ;;  %2548 = vmatmul.mubr.bf16.gmra.mrb[32].mxu0 %v365_v25  ;;  %v6198_v38 = vpop.f32.mrb[11].mxu1  ;;  %v5613_v25 = vld [vmem:[#allocation10 + $0xb8] sm:$0xff]   ;;  %v6279_v29 = vadd.f32 %v6192_v35, %v6243_v4  ;;  %v6283_v30 = vadd.f32 %v6194_v36, %v6241_v3 }
 0x188   :  { %2484 = vmatprep.mubr.bf16.mxu1 %v5979_v0  ;;  %2557 = vmatprep.mubr.bf16.mxu0 %v5979_v0 }
 0x189   :  { %5248 = vmatpush3.bf16.msra.mxu1 %v5600_v12  ;;  %5288 = vmatpush3.bf16.msra.mxu0 %v5601_v13  ;;  %v6263_v12 = vadd.f32 %v6182_v31, %v6243_v4 }
 0x18a   :  { %5249 = vmatprep.subr.bf16.mxu1 %v5602_v14  ;;  %5289 = vmatprep.subr.bf16.mxu0 %v5603_v15 }
 0x18c   :  { %v6206_v41 = vpop.f32.mrb[12].mxu1 }
 0x18d   :  { %v6208_v42 = vpop.f32.mrb[13].mxu1  ;;  %5250 = vmatpush3.bf16.msra.mxu1 %v5604_v16  ;;  %5290 = vmatpush3.bf16.msra.mxu0 %v5605_v17 }
 0x18e   :  { %v6210_v43 = vpop.f32.mrb[14].mxu1  ;;  %5251 = vmatprep.subr.bf16.mxu1 %v5606_v18  ;;  %5291 = vmatprep.subr.bf16.mxu0 %v5607_v19 }
 0x18f   :  { %2485 = vmatmul.mubr.bf16.gmra.mrb[28].mxu1 %v366_v23  ;;  %2558 = vmatmul.mubr.bf16.gmra.mrb[36].mxu0 %v366_v23  ;;  %v6214_v45 = vpop.f32.mrb[15].mxu1  ;;  %v5611_v23 = vld [vmem:[#allocation10 + $0xf8] sm:$0xff]  }
 0x191   :  { %v6196_v37 = vpop.f32.mrb[8].mxu0  ;;  %5252 = vmatpush3.bf16.msra.mxu1 %v5608_v20  ;;  %5292 = vmatpush3.bf16.msra.mxu0 %v5609_v21 }
 0x192   :  { %v6200_v39 = vpop.f32.mrb[9].mxu0  ;;  %5253 = vmatprep.subr.bf16.mxu1 %v5610_v22  ;;  %5293 = vmatprep.subr.bf16.mxu0 %v5611_v23  ;;  %v717_v32 = vadd.f32 %v6196_v37, %v6245_v5 }
 0x193   :  { %v6202_v40 = vpop.f32.mrb[10].mxu0  ;;  %v719_v33 = vadd.f32 %v6200_v39, %v6247_v6 }
 0x194   :  { %v6204_v0 = vpop.f32.mrb[11].mxu0  ;;  %v721_v35 = vadd.f32 %v6202_v40, %v6245_v5 }
 0x195   :  { %5254 = vmatpush3.bf16.msra.mxu1 %v5612_v24  ;;  %5294 = vmatpush3.bf16.msra.mxu0 %v5613_v25  ;;  %v723_v17 = vadd.f32 %v6204_v0, %v6247_v6 }
 0x196   :  { %5319 = vmatprep.subr.bf16.mxu1 %v5614_v57  ;;  %5359 = vmatprep.subr.bf16.mxu0 %v5615_v58 }
 0x199   :  { %v6212_v44 = vpop.f32.mrb[12].mxu0 }
 0x19a   :  { %v6216_v46 = vpop.f32.mrb[13].mxu0 }
 0x19b   :  { %v6218_v47 = vpop.f32.mrb[14].mxu0 }
 0x19c   :  { %v6220_v48 = vpop.f32.mrb[15].mxu0 }
 0x1a1   :  { %v6222_v49 = vpop.f32.mrb[16].mxu0 }
 0x1a2   :  { %v6224_v50 = vpop.f32.mrb[17].mxu0 }
 0x1a3   :  { %v6226_v51 = vpop.f32.mrb[18].mxu0 }
 0x1a4   :  { %v6228_v52 = vpop.f32.mrb[19].mxu0 }
 0x1a9   :  { %v6230_v53 = vpop.f32.mrb[20].mxu0 }
 0x1aa   :  { %v6232_v54 = vpop.f32.mrb[21].mxu0 }
 0x1ab   :  { %v6234_v55 = vpop.f32.mrb[22].mxu0 }
 0x1ac   :  { %v6236_v56 = vpop.f32.mrb[23].mxu0 }
 0x24a   :  { %v2456_v31 = vpop.f32.mrb[16].mxu1  ;;  %v2529_v13 = vpop.f32.mrb[24].mxu0 }
 0x24b   :  { %v2568_v14 = vmul.f32 0.0, %v2456_v31  ;;  %v2570_v15 = vmul.f32 0.0, %v2529_v13  ;;  %v2458_v34 = vpop.f32.mrb[17].mxu1  ;;  %v2531_v16 = vpop.f32.mrb[25].mxu0 }
 0x24c   :  { %v2569_v36 = vmul.f32 0.0, %v2458_v34  ;;  %v2571_v18 = vmul.f32 0.0, %v2531_v16  ;;  %v2460_v19 = vpop.f32.mrb[18].mxu1  ;;  %v2533_v20 = vpop.f32.mrb[26].mxu0  ;;  %v729_v16 = vadd.f32 %v6216_v46, %v6247_v6 }
 0x24d   :  { %v6293_v21 = vadd.f32 %v2568_v14, %v644_v7  ;;  %v6295_v37 = vadd.f32 %v2570_v15, %v717_v32  ;;  %v2572_v22 = vmul.f32 0.0, %v2460_v19  ;;  %v2574_v39 = vmul.f32 0.0, %v2533_v20  ;;  %v2462_v23 = vpop.f32.mrb[19].mxu1  ;;  %v2535_v24 = vpop.f32.mrb[27].mxu0 }
 0x24e   :  { %v6297_v25 = vadd.f32 %v2569_v36, %v646_v8  ;;  %v6299_v57 = vadd.f32 %v2571_v18, %v719_v33  ;;  %v2573_v40 = vmul.f32 0.0, %v2462_v23  ;;  %v2575_v58 = vmul.f32 0.0, %v2535_v24 }
 0x24f   :  { %v5048_v0 = vmul.f32 -1.702, %v6293_v21  ;;  %v5050_v59 = vmul.f32 -1.702, %v6295_v37  ;;  %v6303_v60 = vadd.f32 %v2572_v22, %v648_v9  ;;  %v6305_v61 = vadd.f32 %v2574_v39, %v721_v35 }
 0x250   :  { %v5049_v62 = vmul.f32 -1.702, %v6297_v25  ;;  %v5051_v63 = vmul.f32 -1.702, %v6299_v57  ;;  %v6309_v1 = vadd.f32 %v2573_v40, %v650_v10  ;;  %v6311_v2 = vadd.f32 %v2575_v58, %v723_v17 }
 0x251   :  { %v6315_v7 = vadd.f32 %v6198_v38, %v6243_v4  ;;  %v2696_v8 = vmul.f32 1.442695, %v5048_v0  ;;  %v2700_v31 = vmul.f32 1.442695, %v5050_v59  ;;  %v5052_v13 = vmul.f32 -1.702, %v6303_v60 }
 0x252   :  { %v6320_v9 = vadd.f32 %v6206_v41, %v6241_v3  ;;  %v2698_v32 = vmul.f32 1.442695, %v5049_v62  ;;  %v2702_v33 = vmul.f32 1.442695, %v5051_v63  ;;  %v5054_v14 = vmul.f32 -1.702, %v6305_v61 }
 0x253   :  { %5654 = vpow2.f32 %v2696_v8  ;;  %v2704_v10 = vmul.f32 1.442695, %v5052_v13  ;;  %v5053_v15 = vmul.f32 -1.702, %v6309_v1  ;;  %v5055_v34 = vmul.f32 -1.702, %v6311_v2 }
 0x254   :  { %v727_v38 = vadd.f32 %v6212_v44, %v6245_v5  ;;  %5656 = vpow2.f32 %v2700_v31  ;;  %v2708_v35 = vmul.f32 1.442695, %v5054_v14  ;;  %v2466_v41 = vpop.f32.mrb[20].mxu1  ;;  %v2539_v17 = vpop.f32.mrb[28].mxu0  ;;  %v731_v36 = vadd.f32 %v6218_v47, %v6245_v5 }
 0x255   :  { %5658 = vpow2.f32 %v2698_v32  ;;  %v2706_v18 = vmul.f32 1.442695, %v5053_v15  ;;  %v2576_v19 = vmul.f32 0.0, %v2466_v41  ;;  %v2468_v20 = vpop.f32.mrb[21].mxu1  ;;  %v2710_v22 = vmul.f32 1.442695, %v5055_v34 }
 0x256   :  { %5660 = vpow2.f32 %v2702_v33  ;;  %v2578_v39 = vmul.f32 0.0, %v2539_v17  ;;  %v2577_v23 = vmul.f32 0.0, %v2468_v20  ;;  %v2541_v24 = vpop.f32.mrb[29].mxu0  ;;  %v2470_v44 = vpop.f32.mrb[22].mxu1  ;;  %v733_v15 = vadd.f32 %v6220_v48, %v6247_v6 }
 0x257   :  { %5662 = vpow2.f32 %v2704_v10  ;;  %v6332_v46 = vadd.f32 %v2576_v19, %v6259_v11  ;;  %v2579_v40 = vmul.f32 0.0, %v2541_v24  ;;  %v2580_v58 = vmul.f32 0.0, %v2470_v44  ;;  %v2543_v0 = vpop.f32.mrb[30].mxu0  ;;  %v2472_v59 = vpop.f32.mrb[23].mxu1 }
 0x258   :  { %5664 = vpow2.f32 %v2708_v35  ;;  %v6334_v47 = vadd.f32 %v2578_v39, %v727_v38  ;;  %v6337_v62 = vadd.f32 %v2577_v23, %v6263_v12  ;;  %v2582_v63 = vmul.f32 0.0, %v2543_v0  ;;  %v2545_v8 = vpop.f32.mrb[31].mxu0 }
 0x259   :  { %5666 = vpow2.f32 %v2706_v18  ;;  %v5056_v31 = vmul.f32 -1.702, %v6332_v46  ;;  %v6340_v13 = vadd.f32 %v2579_v40, %v729_v16  ;;  %v6343_v11 = vadd.f32 %v2580_v58, %v6267_v26 }
 0x25a   :  { %5668 = vpow2.f32 %v2710_v22  ;;  %v5058_v32 = vmul.f32 -1.702, %v6334_v47  ;;  %v5057_v33 = vmul.f32 -1.702, %v6337_v62  ;;  %v6347_v14 = vadd.f32 %v2582_v63, %v731_v36  ;;  %v2476_v10 = vpop.f32.mrb[24].mxu1  ;;  %v2549_v12 = vpop.f32.mrb[32].mxu0 }
 0x25b   :  { %6621 = vst [vmem:[#allocation23_spill] sm:$0xff] %v6340_v13  ;;  %v737_v34 = vadd.f32 %v6222_v49, %v6245_v5  ;;  %v6355_v38 = vadd.f32 %v6224_v50, %v6247_v6  ;;  %v2712_v26 = vmul.f32 1.442695, %v5056_v31  ;;  %v6359_v16 = vadd.f32 %v6226_v51, %v6245_v5  ;;  %v2478_v50 = vpop.f32.mrb[25].mxu1  ;;  %v2551_v39 = vpop.f32.mrb[33].mxu0 }
 0x25c   :  { %v6363_v35 = vadd.f32 %v6228_v52, %v6247_v6  ;;  %v2716_v41 = vmul.f32 1.442695, %v5058_v32  ;;  %v2714_v17 = vmul.f32 1.442695, %v5057_v33  ;;  %v5059_v48 = vmul.f32 -1.702, %v6340_v13 }
 0x25d   :  { %v5655_v36 = vpop.eup %5654  ;;  %5670 = vpow2.f32 %v2712_v26  ;;  %v5060_v49 = vmul.f32 -1.702, %v6343_v11  ;;  %v2581_v18 = vmul.f32 0.0, %v2472_v59  ;;  %v5062_v51 = vmul.f32 -1.702, %v6347_v14  ;;  %v2480_v23 = vpop.f32.mrb[26].mxu1 }
 0x25e   :  { %v5657_v19 = vpop.eup %5656  ;;  %v2760_v20 = vadd.f32 1.0, %v5655_v36  ;;  %5672 = vpow2.f32 %v2716_v41  ;;  %v2583_v22 = vmul.f32 0.0, %v2545_v8  ;;  %v2584_v40 = vmul.f32 0.0, %v2476_v10  ;;  %v2553_v58 = vpop.f32.mrb[34].mxu0 }
 0x25f   :  { %v5659_v52 = vpop.eup %5658  ;;  %v2762_v24 = vadd.f32 1.0, %v5657_v19  ;;  %5674 = vpow2.f32 %v2714_v17  ;;  %v6369_v44 = vadd.f32 %v2581_v18, %v6271_v27  ;;  %v2482_v0 = vpop.f32.mrb[27].mxu1  ;;  %v2586_v32 = vmul.f32 0.0, %v2549_v12 }
 0x260   :  { %v5661_v63 = vpop.eup %5660  ;;  %5676 = vrcp.f32 %v2760_v20  ;;  %v2761_v59 = vadd.f32 1.0, %v5659_v52  ;;  %v6371_v31 = vadd.f32 %v2583_v22, %v733_v15  ;;  %v6373_v33 = vpop.f32.mrb[35].mxu0  ;;  %v6377_v17 = vadd.f32 %v2584_v40, %v6275_v28 }
 0x261   :  { %6622 = vst [vmem:[#allocation24_spill] sm:$0xff] %v6369_v44  ;;  %v5663_v8 = vpop.eup %5662  ;;  %5678 = vrcp.f32 %v2762_v24  ;;  %v2763_v26 = vadd.f32 1.0, %v5661_v63  ;;  %v5061_v41 = vmul.f32 -1.702, %v6369_v44  ;;  %v2718_v36 = vmul.f32 1.442695, %v5059_v48 }
 0x262   :  { %6623 = vst [vmem:[#allocation25_spill] sm:$0xff] %v6371_v31  ;;  %6624 = vst [vmem:[#allocation26_spill] sm:$0xff] %v6377_v17  ;;  %v5665_v27 = vpop.eup %5664  ;;  %5680 = vrcp.f32 %v2761_v59  ;;  %v2764_v10 = vadd.f32 1.0, %v5663_v8  ;;  %v6379_v18 = vadd.f32 %v2586_v32, %v737_v34  ;;  %v6381_v19 = vpop.f32.mrb[28].mxu1  ;;  %v2720_v22 = vmul.f32 1.442695, %v5060_v49 }
 0x263   :  { %v6383_v15 = vpop.f32.mrb[36].mxu0  ;;  %v5667_v12 = vpop.eup %5666  ;;  %5682 = vrcp.f32 %v2763_v26  ;;  %v2766_v20 = vadd.f32 1.0, %v5665_v27  ;;  %v2724_v52 = vmul.f32 1.442695, %v5062_v51  ;;  %v2722_v40 = vmul.f32 1.442695, %v5061_v41 }
 0x264   :  { %6625 = vst [vmem:[#allocation27_spill] sm:$0xff] %v6379_v18  ;;  %v6385_v24 = vpop.f32.mrb[29].mxu1  ;;  %v5669_v63 = vpop.eup %5668  ;;  %5684 = vrcp.f32 %v2764_v10  ;;  %v2765_v28 = vadd.f32 1.0, %v5667_v12  ;;  %v5063_v59 = vmul.f32 -1.702, %v6371_v31  ;;  %v2585_v8 = vmul.f32 0.0, %v2478_v50 }
 0x265   :  { %v6388_v48 = vpop.f32.mrb[37].mxu0  ;;  %5686 = vrcp.f32 %v2766_v20  ;;  %v2767_v34 = vadd.f32 1.0, %v5669_v63  ;;  %v5064_v32 = vmul.f32 -1.702, %v6377_v17  ;;  %v6391_v44 = vpop.f32.mrb[30].mxu1  ;;  %v2587_v51 = vmul.f32 0.0, %v2551_v39 }
 0x266   :  { %v6393_v26 = vpop.f32.mrb[38].mxu0  ;;  %5688 = vrcp.f32 %v2765_v28  ;;  %v5066_v49 = vmul.f32 -1.702, %v6379_v18  ;;  %v2588_v27 = vmul.f32 0.0, %v2480_v23  ;;  %v6396_v10 = vpop.f32.mrb[31].mxu1  ;;  %v6401_v20 = vadd.f32 %v2585_v8, %v6279_v29 }
 0x267   :  { %v6398_v41 = vpop.f32.mrb[39].mxu0  ;;  %v5671_v12 = vpop.eup %5670  ;;  %5690 = vrcp.f32 %v2767_v34  ;;  %v2590_v63 = vmul.f32 0.0, %v2553_v58  ;;  %v2589_v50 = vmul.f32 0.0, %v2482_v0  ;;  %v6404_v28 = vadd.f32 %v2587_v51, %v6355_v38 }
 0x268   :  { %v5673_v17 = vpop.eup %5672  ;;  %v2768_v31 = vadd.f32 1.0, %v5671_v12  ;;  %5692 = vpow2.f32 %v2718_v36  ;;  %v6407_v39 = vadd.f32 %v2588_v27, %v6283_v30  ;;  %v5065_v13 = vmul.f32 -1.702, %v6401_v20 }
 0x269   :  { %v5675_v23 = vpop.eup %5674  ;;  %v2770_v18 = vadd.f32 1.0, %v5673_v17  ;;  %5694 = vpow2.f32 %v2720_v22  ;;  %v6411_v34 = vadd.f32 %v2590_v63, %v6359_v16  ;;  %v5067_v0 = vmul.f32 -1.702, %v6404_v28 }
 0x26a   :  { %v5677_v29 = vpop.eup %5676  ;;  %5696 = vrcp.f32 %v2768_v31  ;;  %v2769_v58 = vadd.f32 1.0, %v5675_v23  ;;  %v5068_v36 = vmul.f32 -1.702, %v6407_v39  ;;  %v2726_v8 = vmul.f32 1.442695, %v5063_v59 }
 0x26b   :  { %v5679_v38 = vpop.eup %5678  ;;  %5698 = vrcp.f32 %v2770_v18  ;;  %v2728_v30 = vmul.f32 1.442695, %v5064_v32  ;;  %v2732_v51 = vmul.f32 1.442695, %v5066_v49  ;;  %v2856_v17 = vmul.f32 %v5677_v29, %v6293_v21 }
 0x26c   :  { %v6415_v27 = vpop.eup %5680  ;;  %5700 = vrcp.f32 %v2769_v58  ;;  %v2730_v22 = vmul.f32 1.442695, %v5065_v13  ;;  %v5070_v16 = vmul.f32 -1.702, %v6411_v34  ;;  %v2858_v31 = vmul.f32 %v5679_v38, %v6295_v37 }
 0x26d   :  { %v6419_v12 = vpop.eup %5682  ;;  %5702 = vpow2.f32 %v2724_v52  ;;  %v2734_v63 = vmul.f32 1.442695, %v5067_v0  ;;  %v6423_v23 = vadd.f32 %v2589_v50, %v6315_v7  ;;  %v2736_v59 = vmul.f32 1.442695, %v5068_v36 }
 0x26e   :  { %v5685_v18 = vpop.eup %5684  ;;  %5704 = vpow2.f32 %v2722_v40  ;;  %v2591_v32 = vmul.f32 0.0, %v6373_v33  ;;  %v2592_v21 = vmul.f32 0.0, %v6381_v19  ;;  %v2594_v37 = vmul.f32 0.0, %v6383_v15 }
 0x26f   :  { %v5687_v49 = vpop.eup %5686  ;;  %v2860_v13 = vmul.f32 %v5685_v18, %v6303_v60  ;;  %5706 = vpow2.f32 %v2726_v8  ;;  %v5069_v29 = vmul.f32 -1.702, %v6423_v23  ;;  %v747_v19 = vadd.f32 %v6230_v53, %v6245_v5 }
 0x270   :  { %v5689_v52 = vpop.eup %5688  ;;  %v2862_v58 = vmul.f32 %v5687_v49, %v6305_v61  ;;  %5708 = vpow2.f32 %v2728_v30  ;;  %v6432_v7 = vadd.f32 %v2591_v32, %v6363_v35  ;;  %v6435_v40 = vadd.f32 %v2592_v21, %v6320_v9 }
 0x271   :  { %v5691_v33 = vpop.eup %5690  ;;  %v6439_v60 = vpack.c.bf16 %v2860_v13, %v2856_v17  ;;  %5710 = vpow2.f32 %v2732_v51  ;;  %v676_v15 = vadd.f32 %v6208_v42, %v6243_v4  ;;  %v2740_v9 = vmul.f32 1.442695, %v5070_v16 }
 0x272   :  { %v5693_v50 = vpop.eup %5692  ;;  %v6443_v0 = vpack.c.bf16 %v2862_v58, %v2858_v31  ;;  %5712 = vpow2.f32 %v2730_v22  ;;  %v5071_v61 = vmul.f32 -1.702, %v6432_v7  ;;  %v6446_v38 = vadd.f32 %v2594_v37, %v747_v19 }
 0x273   :  { %v5695_v35 = vpop.eup %5694  ;;  %v2771_v36 = vadd.f32 1.0, %v5693_v50  ;;  %5714 = vpow2.f32 %v2734_v63  ;;  %v2738_v30 = vmul.f32 1.442695, %v5069_v29  ;;  %v2593_v51 = vmul.f32 0.0, %v6385_v24 }
 0x274   :  { %v6448_v8 = vpop.eup %5696  ;;  %v2772_v53 = vadd.f32 1.0, %v5695_v35  ;;  %5716 = vpow2.f32 %v2736_v59  ;;  %v678_v42 = vadd.f32 %v6210_v43, %v6241_v3  ;;  %v2742_v22 = vmul.f32 1.442695, %v5071_v61 }
 0x275   :  { %v6451_v17 = vpop.eup %5698  ;;  %5718 = vrcp.f32 %v2771_v36  ;;  %v749_v16 = vadd.f32 %v6232_v54, %v6247_v6  ;;  %v6459_v63 = vadd.f32 %v2593_v51, %v676_v15  ;;  %v2595_v18 = vmul.f32 0.0, %v6388_v48 }
 0x276   :  { %v6455_v31 = vpop.eup %5700  ;;  %5720 = vrcp.f32 %v2772_v53  ;;  %v751_v24 = vadd.f32 %v6234_v55, %v6245_v5  ;;  %v680_v32 = vadd.f32 %v6214_v45, %v6243_v4  ;;  %v6467_v43 = vadd.f32 %v6391_v44, %v678_v42  ;;  %v5617_v53 = vld [vmem:[#allocation14 + $0x80] sm:$0xff]  }
 0x277   :  { %v5703_v59 = vpop.eup %5702  ;;  %5722 = vpow2.f32 %v2740_v9  ;;  %v753_v54 = vadd.f32 %v6236_v56, %v6247_v6  ;;  %v6471_v49 = vadd.f32 %v2595_v18, %v749_v16  ;;  %v5072_v55 = vmul.f32 -1.702, %v6435_v40 }
 0x278   :  { %v5705_v3 = vpop.eup %5704  ;;  %v2774_v21 = vadd.f32 1.0, %v5703_v59  ;;  %5724 = vpow2.f32 %v2738_v30  ;;  %v6475_v5 = vadd.f32 %v6393_v26, %v751_v24  ;;  %v2857_v4 = vmul.f32 %v6415_v27, %v6297_v25  ;;  %v5618_v30 = vld [vmem:[#allocation14 + $0x48] sm:$0xff]  }
 0x279   :  { %v5707_v48 = vpop.eup %5706  ;;  %v2773_v13 = vadd.f32 1.0, %v5705_v3  ;;  %5726 = vpow2.f32 %v2742_v22  ;;  %v2861_v44 = vmul.f32 %v5689_v52, %v6309_v1  ;;  %v2863_v29 = vmul.f32 %v5691_v33, %v6311_v2  ;;  %v5619_v22 = vld [vmem:[#allocation14 + $0xc8] sm:$0xff]  }
 0x27a   :  { %v5709_v45 = vpop.eup %5708  ;;  %5728 = vrcp.f32 %v2774_v21  ;;  %v2775_v56 = vadd.f32 1.0, %v5707_v48  ;;  %v5074_v58 = vmul.f32 -1.702, %v6446_v38  ;;  %v2859_v26 = vmul.f32 %v6419_v12, %v6299_v57  ;;  %v5616_v57 = vld [vmem:[#allocation14] sm:$0xff]   ;;  %v5621_v21 = vld [vmem:[#allocation14 + $0x88] sm:$0xff]   ;;  %v5622_v48 = vld [vmem:[#allocation14 + $0x50] sm:$0xff]  }
 0x27b   :  { %v5711_v6 = vpop.eup %5710  ;;  %5730 = vrcp.f32 %v2773_v13  ;;  %v2776_v37 = vadd.f32 1.0, %v5709_v45  ;;  %v6485_v15 = vadd.f32 %v6396_v10, %v680_v32  ;;  %v2744_v27 = vmul.f32 1.442695, %v5072_v55 }
 0x27c   :  { %v5713_v19 = vpop.eup %5712  ;;  %5732 = vrcp.f32 %v2775_v56  ;;  %v2778_v50 = vadd.f32 1.0, %v5711_v6  ;;  %v6488_v52 = vadd.f32 %v6398_v41, %v753_v54  ;;  %v5073_v61 = vmul.f32 -1.702, %v6459_v63  ;;  %v5620_v54 = vld [vmem:[#allocation14 + $0x8] sm:$0xff]   ;;  %v5623_v56 = vld [vmem:[#allocation14 + $0xd0] sm:$0xff]  }
 0x27d   :  { %v5715_v25 = vpop.eup %5714  ;;  %5734 = vrcp.f32 %v2776_v37  ;;  %v2777_v1 = vadd.f32 1.0, %v5713_v19  ;;  %v6491_v35 = vpack.c.bf16 %v2861_v44, %v2857_v4  ;;  %v2748_v10 = vmul.f32 1.442695, %v5074_v58 }
 0x27e   :  { %v5717_v2 = vpop.eup %5716  ;;  %5736 = vrcp.f32 %v2778_v50  ;;  %v2779_v33 = vadd.f32 1.0, %v5715_v25  ;;  %v6493_v9 = vpack.c.bf16 %v2863_v29, %v2859_v26  ;;  %v2864_v41 = vmul.f32 %v6448_v8, %v6332_v46  ;;  %v6626_v26 = vld [vmem:[#allocation23_spill] sm:$0xff]  ;;  %v6627_v25 = vld [vmem:[#allocation24_spill] sm:$0xff] }
 0x27f   :  { %v5719_v12 = vpop.eup %5718  ;;  %5738 = vrcp.f32 %v2777_v1  ;;  %v2780_v36 = vadd.f32 1.0, %v5717_v2  ;;  %v5075_v42 = vmul.f32 -1.702, %v6471_v49  ;;  %3200 = vmatprep.mubr.bf16.mxu1 %v6491_v35  ;;  %v2866_v18 = vmul.f32 %v6451_v17, %v6334_v47  ;;  %v5624_v2 = vld [vmem:[#allocation14 + $0x10] sm:$0xff]  }
 0x280   :  { %v5721_v51 = vpop.eup %5720  ;;  %5740 = vrcp.f32 %v2779_v33  ;;  %v5076_v24 = vmul.f32 -1.702, %v6467_v43  ;;  %3265 = vmatprep.mubr.bf16.mxu0 %v6493_v9  ;;  %3201 = vmatmul.mubr.bf16.vlgmr.msra.gmra.mrb[32].mxu1 %v6439_v60  ;;  %v2746_v32 = vmul.f32 1.442695, %v5073_v61  ;;  %v5078_v3 = vmul.f32 -1.702, %v6475_v5 }
 0x281   :  { %v5723_v16 = vpop.eup %5722  ;;  %v2868_v59 = vmul.f32 %v5721_v51, %v6343_v11  ;;  %5742 = vrcp.f32 %v2780_v36  ;;  %3266 = vmatmul.mubr.bf16.vlgmr.msra.gmra.mrb[40].mxu0 %v6443_v0  ;;  %5320 = vmatpush3.bf16.msra.mxu1 %v5616_v57  ;;  %v5077_v11 = vmul.f32 -1.702, %v6485_v15  ;;  %v2750_v4 = vmul.f32 1.442695, %v5075_v42  ;;  %v6628_v61 = vld [vmem:[#allocation25_spill] sm:$0xff]  ;;  %v5627_v42 = vld [vmem:[#allocation14 + $0xd8] sm:$0xff]  }
 0x282   :  { %v5725_v46 = vpop.eup %5724  ;;  %v2782_v8 = vadd.f32 1.0, %v5723_v16  ;;  %5744 = vpow2.f32 %v2744_v27  ;;  %5360 = vmatpush3.bf16.msra.mxu0 %v5617_v53  ;;  %5321 = vmatprep.subr.bf16.mxu1 %v5618_v30  ;;  %v5079_v44 = vmul.f32 -1.702, %v6488_v52  ;;  %v2865_v29 = vmul.f32 %v6455_v31, %v6337_v62  ;;  %v5625_v51 = vld [vmem:[#allocation14 + $0x90] sm:$0xff]  }
 0x283   :  { %v5727_v47 = vpop.eup %5726  ;;  %v2781_v17 = vadd.f32 1.0, %v5725_v46  ;;  %5746 = vpow2.f32 %v2748_v10  ;;  %v6508_v13 = vpack.c.bf16 %v2868_v59, %v2864_v41  ;;  %5361 = vmatprep.subr.bf16.mxu0 %v5619_v22  ;;  %v2752_v58 = vmul.f32 1.442695, %v5076_v24  ;;  %v5628_v22 = vld [vmem:[#allocation14 + $0x18] sm:$0xff]  }
 0x284   :  { %v5729_v55 = vpop.eup %5728  ;;  %5748 = vrcp.f32 %v2782_v8  ;;  %v2783_v45 = vadd.f32 1.0, %v5727_v47  ;;  %v2867_v50 = vmul.f32 %v5719_v12, %v6626_v26  ;;  %v2756_v27 = vmul.f32 1.442695, %v5078_v3  ;;  %v5626_v12 = vld [vmem:[#allocation14 + $0x58] sm:$0xff]  }
 0x285   :  { %v5731_v6 = vpop.eup %5730  ;;  %v2870_v37 = vmul.f32 %v5729_v55, %v6347_v14  ;;  %5750 = vrcp.f32 %v2781_v17  ;;  %5322 = vmatpush3.bf16.msra.mxu1 %v5620_v54  ;;  %v2754_v36 = vmul.f32 1.442695, %v5077_v11  ;;  %v2758_v31 = vmul.f32 1.442695, %v5079_v44  ;;  %v6629_v24 = vld [vmem:[#allocation26_spill] sm:$0xff]  ;;  %v5631_v17 = vld [vmem:[#allocation14 + $0xe0] sm:$0xff]  }
 0x286   :  { %v5733_v19 = vpop.eup %5732  ;;  %v2869_v1 = vmul.f32 %v5731_v6, %v6627_v25  ;;  %5752 = vrcp.f32 %v2783_v45  ;;  %5362 = vmatpush3.bf16.msra.mxu0 %v5621_v21  ;;  %5323 = vmatprep.subr.bf16.mxu1 %v5622_v48  ;;  %v5629_v3 = vld [vmem:[#allocation14 + $0x98] sm:$0xff]   ;;  %v5632_v21 = vld [vmem:[#allocation14 + $0x20] sm:$0xff]   ;;  %v5634_v44 = vld [vmem:[#allocation14 + $0x68] sm:$0xff]  }
 0x287   :  { %v5735_v33 = vpop.eup %5734  ;;  %v2871_v57 = vmul.f32 %v5733_v19, %v6628_v61  ;;  %5754 = vpow2.f32 %v2746_v32  ;;  %v6517_v62 = vpack.c.bf16 %v2870_v37, %v2866_v18  ;;  %5363 = vmatprep.subr.bf16.mxu0 %v5623_v56  ;;  %v5630_v18 = vld [vmem:[#allocation14 + $0x60] sm:$0xff]   ;;  %v5635_v61 = vld [vmem:[#allocation14 + $0xe8] sm:$0xff]  }
 0x288   :  { %v5737_v14 = vpop.eup %5736  ;;  %5756 = vpow2.f32 %v2750_v4  ;;  %v6519_v10 = vpack.c.bf16 %v2869_v1, %v2865_v29  ;;  %v2872_v46 = vmul.f32 %v5735_v33, %v6629_v24  ;;  %v6630_v55 = vld [vmem:[#allocation27_spill] sm:$0xff]  ;;  %v5636_v1 = vld [vmem:[#allocation14 + $0x28] sm:$0xff]  }
 0x289   :  { %v5739_v53 = vpop.eup %5738  ;;  %5758 = vpow2.f32 %v2752_v58  ;;  %v6521_v30 = vpack.c.bf16 %v2871_v57, %v2867_v50  ;;  %5324 = vmatpush3.bf16.msra.mxu1 %v5624_v2  ;;  %v2874_v45 = vmul.f32 %v5737_v14, %v6630_v55  ;;  %v5633_v2 = vld [vmem:[#allocation14 + $0xa0] sm:$0xff]  }
 0x28a   :  { %v5741_v41 = vpop.eup %5740  ;;  %5760 = vpow2.f32 %v2756_v27  ;;  %3208 = vmatprep.mubr.bf16.mxu1 %v6519_v10  ;;  %5325 = vmatprep.subr.bf16.mxu1 %v5626_v12  ;;  %v2873_v6 = vmul.f32 %v5739_v53, %v6401_v20  ;;  %v5640_v12 = vld [vmem:[#allocation14 + $0x30] sm:$0xff]  }
 0x28b   :  { %v5743_v16 = vpop.eup %5742  ;;  %5762 = vpow2.f32 %v2754_v36  ;;  %3273 = vmatprep.mubr.bf16.mxu0 %v6521_v30  ;;  %3209 = vmatmul.mubr.bf16.gmra.mrb[36].mxu1 %v6508_v13  ;;  %v2875_v58 = vmul.f32 %v5741_v41, %v6404_v28  ;;  %v5638_v28 = vld [vmem:[#allocation14 + $0x70] sm:$0xff]   ;;  %v5642_v41 = vld [vmem:[#allocation14 + $0x78] sm:$0xff]  }
 0x28c   :  { %v5745_v59 = vpop.eup %5744  ;;  %v2876_v8 = vmul.f32 %v5743_v16, %v6407_v39  ;;  %5764 = vpow2.f32 %v2758_v31  ;;  %3274 = vmatmul.mubr.bf16.gmra.mrb[44].mxu0 %v6517_v62  ;;  %v5641_v16 = vld [vmem:[#allocation14 + $0xb0] sm:$0xff]  }
 0x28d   :  { %v5747_v32 = vpop.eup %5746  ;;  %5364 = vmatpush3.bf16.msra.mxu0 %v5625_v51  ;;  %v2784_v47 = vadd.f32 1.0, %v5745_v59  ;;  %5326 = vmatpush3.bf16.msra.mxu1 %v5628_v22  ;;  %v5637_v51 = vld [vmem:[#allocation14 + $0xa8] sm:$0xff]   ;;  %v5644_v22 = vld [vmem:[#allocation14 + $0x38] sm:$0xff]  }
 0x28e   :  { %v5749_v54 = vpop.eup %5748  ;;  %5365 = vmatprep.subr.bf16.mxu0 %v5627_v42  ;;  %v6529_v11 = vpack.c.bf16 %v2876_v8, %v2872_v46  ;;  %v2786_v4 = vadd.f32 1.0, %v5747_v32  ;;  %5327 = vmatprep.subr.bf16.mxu1 %v5630_v18  ;;  %v5639_v42 = vld [vmem:[#allocation14 + $0xf0] sm:$0xff]   ;;  %v5643_v59 = vld [vmem:[#allocation14 + $0xf8] sm:$0xff]  }
 0x28f   :  { %v5751_v48 = vpop.eup %5750  ;;  %v2878_v39 = vmul.f32 %v5749_v54, %v6411_v34  ;;  %5766 = vrcp.f32 %v2784_v47 }
 0x290   :  { %v5753_v56 = vpop.eup %5752  ;;  %v2877_v29 = vmul.f32 %v5751_v48, %v6423_v23  ;;  %5768 = vrcp.f32 %v2786_v4 }
 0x291   :  { %v5755_v37 = vpop.eup %5754  ;;  %v2879_v19 = vmul.f32 %v5753_v56, %v6432_v7  ;;  %5366 = vmatpush3.bf16.msra.mxu0 %v5629_v3  ;;  %v6537_v26 = vpack.c.bf16 %v2878_v39, %v2874_v45  ;;  %5328 = vmatpush3.bf16.msra.mxu1 %v5632_v21  ;;  %v5645_v3 = vld [vmem:[#allocation14 + $0xb8] sm:$0xff]  }
 0x292   :  { %v5757_v50 = vpop.eup %5756  ;;  %v2785_v25 = vadd.f32 1.0, %v5755_v37  ;;  %v6539_v34 = vpack.c.bf16 %v2877_v29, %v2873_v6  ;;  %5367 = vmatprep.subr.bf16.mxu0 %v5631_v17  ;;  %5329 = vmatprep.subr.bf16.mxu1 %v5634_v44 }
 0x293   :  { %v5759_v27 = vpop.eup %5758  ;;  %v2787_v20 = vadd.f32 1.0, %v5757_v50  ;;  %v6541_v23 = vpack.c.bf16 %v2879_v19, %v2875_v58 }
 0x294   :  { %v5761_v7 = vpop.eup %5760  ;;  %5770 = vrcp.f32 %v2785_v25  ;;  %v2788_v33 = vadd.f32 1.0, %v5759_v27  ;;  %3216 = vmatprep.mubr.bf16.mxu1 %v6539_v34 }
 0x295   :  { %v5763_v57 = vpop.eup %5762  ;;  %5772 = vrcp.f32 %v2787_v20  ;;  %v2790_v36 = vadd.f32 1.0, %v5761_v7  ;;  %3281 = vmatprep.mubr.bf16.mxu0 %v6541_v23  ;;  %3217 = vmatmul.mubr.bf16.gmra.mrb[40].mxu1 %v6529_v11 }
 0x296   :  { %v5765_v14 = vpop.eup %5764  ;;  %5774 = vrcp.f32 %v2788_v33  ;;  %v2789_v31 = vadd.f32 1.0, %v5763_v57  ;;  %3282 = vmatmul.mubr.bf16.gmra.mrb[48].mxu0 %v6537_v26  ;;  %5330 = vmatpush3.bf16.msra.mxu1 %v5636_v1 }
 0x297   :  { %5776 = vrcp.f32 %v2790_v36  ;;  %v2791_v53 = vadd.f32 1.0, %v5765_v14  ;;  %5368 = vmatpush3.bf16.msra.mxu0 %v5633_v2  ;;  %5331 = vmatprep.subr.bf16.mxu1 %v5638_v28 }
 0x298   :  { %5778 = vrcp.f32 %v2789_v31  ;;  %5369 = vmatprep.subr.bf16.mxu0 %v5635_v61 }
 0x299   :  { %5780 = vrcp.f32 %v2791_v53  ;;  %v5767_v18 = vpop.eup %5766 }
 0x29a   :  { %5332 = vmatpush3.bf16.msra.mxu1 %v5640_v12  ;;  %v5769_v24 = vpop.eup %5768  ;;  %v2880_v32 = vmul.f32 %v5767_v18, %v6435_v40 }
 0x29b   :  { %5370 = vmatpush3.bf16.msra.mxu0 %v5637_v51  ;;  %5333 = vmatprep.subr.bf16.mxu1 %v5642_v41  ;;  %v2882_v47 = vmul.f32 %v5769_v24, %v6446_v38 }
 0x29c   :  { %5371 = vmatprep.subr.bf16.mxu0 %v5639_v42 }
 0x29e   :  { %v5771_v46 = vpop.eup %5770  ;;  %5334 = vmatpush3.bf16.msra.mxu1 %v5644_v22 }
 0x29f   :  { %v5773_v8 = vpop.eup %5772  ;;  %5372 = vmatpush3.bf16.msra.mxu0 %v5641_v16  ;;  %v2881_v21 = vmul.f32 %v5771_v46, %v6459_v63  ;;  %v5648_v63 = vld [vmem:[#allocation16 + $0x10] sm:$0xff]  }
 0x2a0   :  { %v5775_v54 = vpop.eup %5774  ;;  %5373 = vmatprep.subr.bf16.mxu0 %v5643_v59  ;;  %v2883_v45 = vmul.f32 %v5773_v8, %v6471_v49  ;;  %v5650_v49 = vld [vmem:[#allocation16 + $0x20] sm:$0xff]  }
 0x2a1   :  { %v5777_v17 = vpop.eup %5776  ;;  %v2884_v48 = vmul.f32 %v5775_v54, %v6467_v43  ;;  %v5649_v43 = vld [vmem:[#allocation16 + $0x18] sm:$0xff]  }
 0x2a2   :  { %v5779_v55 = vpop.eup %5778  ;;  %v2886_v39 = vmul.f32 %v5777_v17, %v6475_v5  ;;  %v5651_v5 = vld [vmem:[#allocation16 + $0x28] sm:$0xff]  }
 0x2a3   :  { %v5781_v4 = vpop.eup %5780  ;;  %v2885_v44 = vmul.f32 %v5779_v55, %v6485_v15  ;;  %v2900_v40 = vpack.c.bf16 %v2884_v48, %v2880_v32  ;;  %5374 = vmatpush3.bf16.msra.mxu0 %v5645_v3  ;;  %v5652_v15 = vld [vmem:[#allocation16 + $0x30] sm:$0xff]  }
 0x2a4   :  { %v2887_v56 = vmul.f32 %v5781_v4, %v6488_v52  ;;  %v2902_v6 = vpack.c.bf16 %v2886_v39, %v2882_v47  ;;  %v5653_v52 = vld [vmem:[#allocation16 + $0x38] sm:$0xff]  }
 0x2a5   :  { %v2901_v38 = vpack.c.bf16 %v2885_v44, %v2881_v21 }
 0x2a6   :  { %v2903_v29 = vpack.c.bf16 %v2887_v56, %v2883_v45 }
 0x2a7   :  { %3224 = vmatprep.mubr.bf16.mxu1 %v2901_v38 }
 0x2a8   :  { %3289 = vmatprep.mubr.bf16.mxu0 %v2903_v29  ;;  %3225 = vmatmul.mubr.bf16.gmra.mrb[44].mxu1 %v2900_v40 }
 0x2a9   :  { %3290 = vmatmul.mubr.bf16.gmra.mrb[52].mxu0 %v2902_v6  ;;  %3610 = vmatprep.mubr.bf16.mxu1 %v6491_v35 }
 0x2aa   :  { %3675 = vmatprep.mubr.bf16.mxu0 %v6493_v9 }
 0x2b0   :  { %3611 = vmatmul.mubr.bf16.vlgmr.msra.gmra.mrb[48].mxu1 %v6439_v60  ;;  %v5646_v60 = vld [vmem:[#allocation16] sm:$0xff]  }
 0x2b1   :  { %3676 = vmatmul.mubr.bf16.vlgmr.msra.gmra.mrb[56].mxu0 %v6443_v0  ;;  %3618 = vmatprep.mubr.bf16.mxu1 %v6519_v10  ;;  %v5647_v0 = vld [vmem:[#allocation16 + $0x8] sm:$0xff]  }
 0x2b2   :  { %3683 = vmatprep.mubr.bf16.mxu0 %v6521_v30  ;;  %5435 = vmatprep.subr.bf16.mxu1 %v5646_v60 }
 0x2b3   :  { %5436 = vmatpush3.bf16.msra.mxu1 %v5646_v60 }
 0x2b4   :  { %5437 = vmatprep.subr.bf16.mxu1 %v5647_v0 }
 0x2b7   :  { %5438 = vmatpush3.bf16.msra.mxu1 %v5647_v0 }
 0x2b8   :  { %3619 = vmatmul.mubr.bf16.gmra.mrb[52].mxu1 %v6508_v13  ;;  %5439 = vmatprep.subr.bf16.mxu1 %v5648_v63 }
 0x2b9   :  { %3684 = vmatmul.mubr.bf16.gmra.mrb[60].mxu0 %v6517_v62  ;;  %3626 = vmatprep.mubr.bf16.mxu1 %v6539_v34 }
 0x2ba   :  { %3691 = vmatprep.mubr.bf16.mxu0 %v6541_v23 }
 0x2bb   :  { %5440 = vmatpush3.bf16.msra.mxu1 %v5648_v63 }
 0x2bc   :  { %5441 = vmatprep.subr.bf16.mxu1 %v5649_v43 }
 0x2bf   :  { %5442 = vmatpush3.bf16.msra.mxu1 %v5649_v43 }
 0x2c0   :  { %3627 = vmatmul.mubr.bf16.gmra.mrb[56].mxu1 %v6529_v11  ;;  %5443 = vmatprep.subr.bf16.mxu1 %v5650_v49 }
 0x2c1   :  { %3692 = vmatmul.mubr.bf16.gmra.mrb[64].mxu0 %v6537_v26  ;;  %3634 = vmatprep.mubr.bf16.mxu1 %v2901_v38 }
 0x2c2   :  { %3699 = vmatprep.mubr.bf16.mxu0 %v2903_v29 }
 0x2c3   :  { %5444 = vmatpush3.bf16.msra.mxu1 %v5650_v49 }
 0x2c4   :  { %5445 = vmatprep.subr.bf16.mxu1 %v5651_v5 }
 0x2c7   :  { %5446 = vmatpush3.bf16.msra.mxu1 %v5651_v5 }
 0x2c8   :  { %3635 = vmatmul.mubr.bf16.gmra.mrb[60].mxu1 %v2900_v40  ;;  %5447 = vmatprep.subr.bf16.mxu1 %v5652_v15 }
 0x2c9   :  { %3700 = vmatmul.mubr.bf16.gmra.mrb[68].mxu0 %v2902_v6 }
 0x2cb   :  { %5448 = vmatpush3.bf16.msra.mxu1 %v5652_v15 }
 0x2cc   :  { %5449 = vmatprep.subr.bf16.mxu1 %v5653_v52 }
 0x2cf   :  { %5450 = vmatpush3.bf16.msra.mxu1 %v5653_v52 }
 0x353   :  { %v5255_v35 = vpop.f32.mrb[32].mxu1 }
 0x354   :  { %v5295_v9 = vpop.f32.mrb[40].mxu0  ;;  %v5256_v13 = vpop.f32.mrb[33].mxu1 }
 0x355   :  { %v5257_v62 = vadd.f32 %v5256_v13, %v5255_v35  ;;  %v5296_v10 = vpop.f32.mrb[41].mxu0  ;;  %v5258_v30 = vpop.f32.mrb[34].mxu1 }
 0x356   :  { %v5297_v11 = vadd.f32 %v5296_v10, %v5295_v9  ;;  %v5298_v37 = vpop.f32.mrb[42].mxu0  ;;  %v5259_v58 = vpop.f32.mrb[35].mxu1 }
 0x357   :  { %v5260_v19 = vadd.f32 %v5259_v58, %v5258_v30  ;;  %v5299_v26 = vpop.f32.mrb[43].mxu0 }
 0x358   :  { %v6567_v50 = vadd.f32 %v5297_v11, %v5257_v62  ;;  %v5300_v25 = vadd.f32 %v5299_v26, %v5298_v37 }
 0x35a   :  { %v6569_v34 = vadd.f32 %v5300_v25, %v5260_v19 }
 0x35e   :  { %v5261_v1 = vpop.f32.mrb[36].mxu1 }
 0x35f   :  { %v5301_v27 = vpop.f32.mrb[44].mxu0  ;;  %v5262_v20 = vpop.f32.mrb[37].mxu1 }
 0x360   :  { %v5263_v23 = vadd.f32 %v5262_v20, %v5261_v1  ;;  %v5302_v2 = vpop.f32.mrb[45].mxu0  ;;  %v5264_v28 = vpop.f32.mrb[38].mxu1 }
 0x361   :  { %v5303_v7 = vadd.f32 %v5302_v2, %v5301_v27  ;;  %v5304_v33 = vpop.f32.mrb[46].mxu0  ;;  %v5265_v61 = vpop.f32.mrb[39].mxu1 }
 0x362   :  { %v5266_v57 = vadd.f32 %v5265_v61, %v5264_v28  ;;  %v5305_v36 = vpop.f32.mrb[47].mxu0 }
 0x363   :  { %v6571_v14 = vadd.f32 %v5303_v7, %v5263_v23  ;;  %v5306_v31 = vadd.f32 %v5305_v36, %v5304_v33 }
 0x365   :  { %v6573_v12 = vadd.f32 %v5306_v31, %v5266_v57 }
 0x368   :  { %v5267_v53 = vpop.f32.mrb[40].mxu1 }
 0x369   :  { %v5307_v51 = vpop.f32.mrb[48].mxu0  ;;  %v5268_v41 = vpop.f32.mrb[41].mxu1 }
 0x36a   :  { %v5269_v42 = vadd.f32 %v5268_v41, %v5267_v53  ;;  %v5308_v22 = vpop.f32.mrb[49].mxu0  ;;  %v5270_v16 = vpop.f32.mrb[42].mxu1 }
 0x36b   :  { %v5309_v18 = vadd.f32 %v5308_v22, %v5307_v51  ;;  %v5310_v59 = vpop.f32.mrb[50].mxu0  ;;  %v5271_v24 = vpop.f32.mrb[43].mxu1 }
 0x36c   :  { %v5272_v46 = vadd.f32 %v5271_v24, %v5270_v16  ;;  %v5311_v8 = vpop.f32.mrb[51].mxu0 }
 0x36d   :  { %v6575_v32 = vadd.f32 %v5309_v18, %v5269_v42  ;;  %v5312_v3 = vadd.f32 %v5311_v8, %v5310_v59 }
 0x36f   :  { %v6577_v54 = vadd.f32 %v5312_v3, %v5272_v46 }
 0x37b   :  { %v5273_v47 = vpop.f32.mrb[44].mxu1 }
 0x37c   :  { %v5313_v17 = vpop.f32.mrb[52].mxu0  ;;  %v5274_v21 = vpop.f32.mrb[45].mxu1 }
 0x37d   :  { %v5275_v48 = vadd.f32 %v5274_v21, %v5273_v47  ;;  %v5314_v55 = vpop.f32.mrb[53].mxu0  ;;  %v5276_v45 = vpop.f32.mrb[46].mxu1 }
 0x37e   :  { %v5315_v39 = vadd.f32 %v5314_v55, %v5313_v17  ;;  %v5316_v4 = vpop.f32.mrb[54].mxu0  ;;  %v5277_v44 = vpop.f32.mrb[47].mxu1 }
 0x37f   :  { %v5278_v40 = vadd.f32 %v5277_v44, %v5276_v45  ;;  %v5317_v56 = vpop.f32.mrb[55].mxu0 }
 0x380   :  { %v6579_v6 = vadd.f32 %v5315_v39, %v5275_v48  ;;  %v5318_v38 = vadd.f32 %v5317_v56, %v5316_v4 }
 0x382   :  { %v6581_v29 = vadd.f32 %v5318_v38, %v5278_v40 }
 0x383   :  { %v5335_v60 = vpop.f32.mrb[48].mxu1 }
 0x384   :  { %v5375_v0 = vpop.f32.mrb[56].mxu0  ;;  %v5336_v63 = vpop.f32.mrb[49].mxu1 }
 0x385   :  { %v5337_v43 = vadd.f32 %v5336_v63, %v5335_v60  ;;  %v5376_v49 = vpop.f32.mrb[57].mxu0  ;;  %v5338_v5 = vpop.f32.mrb[50].mxu1 }
 0x386   :  { %v5377_v15 = vadd.f32 %v5376_v49, %v5375_v0  ;;  %v5378_v52 = vpop.f32.mrb[58].mxu0  ;;  %v5339_v35 = vpop.f32.mrb[51].mxu1  ;;  %v5225_v49 = vld [vmem:[%s6610_s4] ss:$0 sm:$0xff]  ;;  %s5980_s4 = smov [#allocation17]  }
 0x387   :  { %v5340_v9 = vadd.f32 %v5339_v35, %v5338_v5  ;;  %v5379_v13 = vpop.f32.mrb[59].mxu0  ;;  %s4825_s14 = sshll.u32 %s5980_s4, 4  ;;  %s4826_s14 = int_to_ptr.vmem [resolvable:$true] %s4825_s14 }
 0x388   :  { %v3678_v62 = vadd.f32 %v5377_v15, %v5337_v43  ;;  %v5380_v10 = vadd.f32 %v5379_v13, %v5378_v52  ;;  %v4755_v15 = vadd.f32 %v5225_v49, %v6571_v14  ;;  %s5936_s13 = scalar_lea.vmem %s4826_s14, 1024  ;;  %p5941_p1 = scmp.lt.s32.totalorder %s4826_s14, %s4826_s14 }
 0x389   :  { %p5937_p0 = scmp.ne.s32.totalorder %s4826_s14, %s5936_s13  ;;  %p5942_p2 = scmp.lt.s32.totalorder %s5936_s13, %s5936_s13 }
 0x38a   :  { %v3681_v30 = vadd.f32 %v5380_v10, %v5340_v9  ;;  %v4753_v9 = vadd.f32 %v5225_v49, %v6567_v50  ;;  %v4759_v50 = vadd.f32 %v5225_v49, %v6579_v6 }
 0x38b   :  { %v5341_v11 = vpop.f32.mrb[52].mxu1  ;;  %p5943_p3 = por %p5942_p2, %p5941_p1 }
 0x38c   :  { %v5381_v37 = vpop.f32.mrb[60].mxu0  ;;  %v5342_v58 = vpop.f32.mrb[53].mxu1  ;;  %v4605_v19 = vpack.c.bf16 %v3681_v30, %v3678_v62  ;;  %v4756_v30 = vadd.f32 %v5225_v49, %v6573_v12  ;;  %v4757_v12 = vadd.f32 %v5225_v49, %v6575_v32 }
 0x38d   :  { %v5343_v26 = vadd.f32 %v5342_v58, %v5341_v11  ;;  %v5382_v25 = vpop.f32.mrb[61].mxu0  ;;  %v5344_v1 = vpop.f32.mrb[54].mxu1  ;;  %p5944_p4 = pnand %p5943_p3, %p5937_p0 }
 0x38e   :  { %v5383_v27 = vadd.f32 %v5382_v25, %v5381_v37  ;;  %v5384_v20 = vpop.f32.mrb[62].mxu0  ;;  %5451 = vmatprep.mubr.bf16.mxu1 %v4605_v19  ;;  %v5345_v23 = vpop.f32.mrb[55].mxu1  ;;  %v4754_v19 = vadd.f32 %v5225_v49, %v6569_v34 }
 0x38f   :  { %v5346_v2 = vadd.f32 %v5345_v23, %v5344_v1  ;;  %v5385_v28 = vpop.f32.mrb[63].mxu0  ;;  %v4760_v23 = vadd.f32 %v5225_v49, %v6581_v29 }
 0x390   :  { %v3686_v7 = vadd.f32 %v5383_v27, %v5343_v26  ;;  %v5386_v33 = vadd.f32 %v5385_v28, %v5384_v20 }
 0x392   :  { %v3689_v61 = vadd.f32 %v5386_v33, %v5346_v2 }
 0x393   :  { %v5347_v57 = vpop.f32.mrb[56].mxu1 }
 0x394   :  { %v4606_v36 = vpack.c.bf16 %v3689_v61, %v3686_v7  ;;  %v5387_v31 = vpop.f32.mrb[64].mxu0  ;;  %v5348_v53 = vpop.f32.mrb[57].mxu1 }
 0x395   :  { %v5349_v51 = vadd.f32 %v5348_v53, %v5347_v57  ;;  %v5388_v41 = vpop.f32.mrb[65].mxu0  ;;  %v5350_v42 = vpop.f32.mrb[58].mxu1  ;;  %v4758_v57 = vadd.f32 %v5225_v49, %v6577_v54 }
 0x396   :  { %v5389_v22 = vadd.f32 %v5388_v41, %v5387_v31  ;;  %v5390_v16 = vpop.f32.mrb[66].mxu0  ;;  %5452 = vmatmul.mubr.bf16.vlgmr.msra.gmra.mrb[64].mxu1 %v4606_v36  ;;  %v5351_v18 = vpop.f32.mrb[59].mxu1 }
 0x397   :  { %v5352_v59 = vadd.f32 %v5351_v18, %v5350_v42  ;;  %v5391_v24 = vpop.f32.mrb[67].mxu0 }
 0x398   :  { %v3694_v46 = vadd.f32 %v5389_v22, %v5349_v51  ;;  %v5392_v8 = vadd.f32 %v5391_v24, %v5390_v16 }
 0x39a   :  { %v3697_v3 = vadd.f32 %v5392_v8, %v5352_v59 }
 0x39b   :  { %v5353_v47 = vpop.f32.mrb[60].mxu1 }
 0x39c   :  { %v5393_v17 = vpop.f32.mrb[68].mxu0  ;;  %v5354_v21 = vpop.f32.mrb[61].mxu1  ;;  %v4607_v48 = vpack.c.bf16 %v3697_v3, %v3694_v46 }
 0x39d   :  { %v5355_v55 = vadd.f32 %v5354_v21, %v5353_v47  ;;  %v5394_v45 = vpop.f32.mrb[69].mxu0  ;;  %v5356_v39 = vpop.f32.mrb[62].mxu1 }
 0x39e   :  { %v5395_v4 = vadd.f32 %v5394_v45, %v5393_v17  ;;  %v5396_v44 = vpop.f32.mrb[70].mxu0  ;;  %5455 = vmatprep.mubr.bf16.mxu1 %v4607_v48  ;;  %v5357_v40 = vpop.f32.mrb[63].mxu1 }
 0x39f   :  { %v5358_v56 = vadd.f32 %v5357_v40, %v5356_v39  ;;  %v5397_v38 = vpop.f32.mrb[71].mxu0 }
 0x3a0   :  { %v3702_v60 = vadd.f32 %v5395_v4, %v5355_v55  ;;  %v5398_v0 = vadd.f32 %v5397_v38, %v5396_v44 }
 0x3a2   :  { %v3705_v63 = vadd.f32 %v5398_v0, %v5358_v56 }
 0x3a4   :  { %v4608_v43 = vpack.c.bf16 %v3705_v63, %v3702_v60 }
 0x3a6   :  { %5456 = vmatmul.mubr.bf16.gmra.mrb[68].mxu1 %v4608_v43 }
 0x469   :  { %v5453_v5 = vpop.f32.mrb[64].mxu1 }
 0x46a   :  { %v4763_v52 = vmul.f32 0.0, %v5453_v5  ;;  %v4707_v35 = vpop.f32.mrb[65].mxu1 }
 0x46b   :  { %v4761_v13 = vmul.f32 0.0, %v4707_v35  ;;  %v5454_v62 = vpop.f32.mrb[66].mxu1 }
 0x46c   :  { %v4771_v10 = vadd.f32 %v4763_v52, %v4755_v15  ;;  %v4764_v11 = vmul.f32 0.0, %v5454_v62  ;;  %v4710_v37 = vpop.f32.mrb[67].mxu1 }
 0x46d   :  { %v4769_v58 = vadd.f32 %v4761_v13, %v4753_v9  ;;  %v4762_v26 = vmul.f32 0.0, %v4710_v37 }
 0x46e   :  { %4779 = vst [vmem:[#allocation17 + $0x10] sm:$0xff] %v4771_v10  ;;  %v4772_v25 = vadd.f32 %v4764_v11, %v4756_v30 }
 0x46f   :  { %4777 = vst [vmem:[#allocation17] sm:$0xff] %v4769_v58  ;;  %v4770_v1 = vadd.f32 %v4762_v26, %v4754_v19 }
 0x470   :  { %4780 = vst [vmem:[#allocation17 + $0x18] sm:$0xff] %v4772_v25 }
 0x471   :  { %4778 = vst [vmem:[#allocation17 + $0x8] sm:$0xff] %v4770_v1 }
 0x479   :  { %v5457_v14 = vpop.f32.mrb[68].mxu1 }
 0x47a   :  { %v4767_v27 = vmul.f32 0.0, %v5457_v14  ;;  %v4723_v20 = vpop.f32.mrb[69].mxu1 }
 0x47b   :  { %v4765_v2 = vmul.f32 0.0, %v4723_v20  ;;  %v5458_v28 = vpop.f32.mrb[70].mxu1 }
 0x47c   :  { %v4775_v7 = vadd.f32 %v4767_v27, %v4759_v50  ;;  %v4776_v34 = vadd.f32 %v5458_v28, %v4760_v23  ;;  %v4726_v33 = vpop.f32.mrb[71].mxu1 }
 0x47d   :  { %v4773_v61 = vadd.f32 %v4765_v2, %v4757_v12  ;;  %v4766_v36 = vmul.f32 0.0, %v4726_v33 }
 0x47e   :  { %4783 = vst [vmem:[#allocation17 + $0x30] sm:$0xff] %v4775_v7  ;;  %4784 = vst [vmem:[#allocation17 + $0x38] sm:$0xff] %v4776_v34 }
 0x47f   :  { %4781 = vst [vmem:[#allocation17 + $0x20] sm:$0xff] %v4773_v61  ;;  %v4774_v6 = vadd.f32 %v4766_v36, %v4758_v57 }
 0x481   :  { %4782 = vst [vmem:[#allocation17 + $0x28] sm:$0xff] %v4774_v6 }
 0x482   :  { %5947 = shalt.err (!%p5944_p4)
}
 0x483   :  { %s5948_s16 = scalar_lea.hbm %s6615_s9, 1024 }
 0x484   :  { %p5949_p5 = scmp.ne.s32.totalorder %s6615_s9, %s5948_s16  ;;  %p5952_p6 = scmp.lt.u32.totalorder %s5948_s16, %s6615_s9 }
 0x486   :  { %p5954_p7 = pnand %p5952_p6, %p5949_p5 }
 0x488   :  { %5957 = shalt.err (!%p5954_p7)
}
 0x489   :  { %s5981_s26 = smov 128   ;;  %s5982_s22 = smov 8  }
 0x48a   :  { %4831 = dma.vmem_to_hbm [thread:$0]  %s4826_s14, 1024, %s6615_s9, [#allocation7], %s5981_s26, %s5981_s26, %s5982_s22  }
 0x48b   :  { %5966 = dma.done.wait [#allocation7], 1024  }
 0x48c   :  { %5967 = vsyncadd [#allocation7], 4294966272 }
 0x48d   :  { %4835 = vsyncpa [#allocation6], 1 }
 0x48e   :  { %4836 = vsyncpa [#allocation9], 1 }
 0x48f   :  { %4837 = vsyncpa [#allocation12], 1 }
 0x490   :  { %4838 = vsyncpa [#allocation15], 1 }
 0x491   :  { %4839 = vsyncpa [#allocation7], 1 }

</bundles_post_ra>
